<compile_context>
chip_gen: v5e
topology: v5e:2x2
jax: 0.10.0
libtpu: 0.0.40
codegen_flags: <defaults>
</compile_context>

<pallas_src>
import functools
import math

import jax
import jax.numpy as jnp
from jax import lax
from jax.experimental import pallas as pl
from jax.experimental.pallas import tpu as pltpu

D_MODEL = 32
N_HEADS = 4
D_K = D_MODEL // N_HEADS
D_FF = 64
EPS = 1e-6            # LayerNormalization eps
MASK_VALUE = -1e9     # float32 masking value from the reference code
SCALE = 1.0 / math.sqrt(D_K)


# ---------------------------------------------------------------------------
# in-kernel helpers
# ---------------------------------------------------------------------------
def _layernorm(x, alpha, bias):
    # matches the PyTorch module: unbiased std (ddof=1), alpha*(x-mean)/(std+eps)+bias
    mean = jnp.mean(x, axis=-1, keepdims=True)
    var = jnp.sum((x - mean) ** 2, axis=-1, keepdims=True) / (x.shape[-1] - 1)
    return alpha * (x - mean) / (jnp.sqrt(var) + EPS) + bias   # exact divide


# ---------------------------------------------------------------------------
# Pallas kernel: whole decoder block for `bb` batch elements per grid step
# ---------------------------------------------------------------------------
def decoder_block_kernel(x_ref, enc_ref, tgt_bias_ref, src_bias_ref,
                         sa_wqkv_ref, sa_wo_ref,
                         ca_wq_ref, ca_wkv_ref, ca_wo_ref,
                         ff_w1_ref, ff_b1_ref, ff_w2_ref, ff_b2_ref,
                         norm_ref, out_ref, attn_scratch, *, bb, T, Ts):
    D = D_MODEL

    x = x_ref[...]                # (bb*T, D)
    enc = enc_ref[...]            # (bb*Ts, D)
    tgt_bias = tgt_bias_ref[...]  # (T, T)   additive mask bias (shared over batch)
    src_bias = src_bias_ref[...]  # (T, Ts)

    def attention(q, k, v, bias, wo, t_k):
        # q: (bb*T, D) (already pre-scaled via folded weights); k, v: (bb*t_k, D)
        # Every head writes its (T, D_K) p@v into its lane slice of the shared
        # scratch; ONE (bb*T, D) x (D, D) matmul does the output projection for
        # all heads and all bb batch elements at once.
        for b in range(bb):
            qb = q[b * T:(b + 1) * T, :]
            kb = k[b * t_k:(b + 1) * t_k, :]
            vb = v[b * t_k:(b + 1) * t_k, :]
            for h in range(N_HEADS):
                sl = slice(h * D_K, (h + 1) * D_K)
                # contract the head dims directly (no explicit transpose)
                s = lax.dot_general(qb[:, sl], kb[:, sl],
                                    (((1,), (1,)), ((), ())),
                                    preferred_element_type=jnp.float32)
                s = s + bias
                s = s - jnp.max(s, axis=-1, keepdims=True)      # stable softmax
                e = jnp.exp(s)
                p = e * pl.reciprocal(jnp.sum(e, axis=-1, keepdims=True),
                                      approx=True)
                pv = jnp.dot(p, vb[:, sl], preferred_element_type=jnp.float32)
                attn_scratch[b * T:(b + 1) * T, sl] = pv
        return jnp.dot(attn_scratch[...], wo, preferred_element_type=jnp.float32)

    # residual 0: self attention (dropout = identity); SCALE folded into W_q
    h = _layernorm(x, norm_ref[0, 0], norm_ref[0, 1])
    qkv = jnp.dot(h, sa_wqkv_ref[...], preferred_element_type=jnp.float32)
    x = x + attention(qkv[:, :D], qkv[:, D:2 * D], qkv[:, 2 * D:],
                      tgt_bias, sa_wo_ref[...], T)

    # residual 1: cross attention against the (un-normed) encoder output
    h = _layernorm(x, norm_ref[1, 0], norm_ref[1, 1])
    q = jnp.dot(h, ca_wq_ref[...], preferred_element_type=jnp.float32)
    kv = jnp.dot(enc, ca_wkv_ref[...], preferred_element_type=jnp.float32)
    x = x + attention(q, kv[:, :D], kv[:, D:], src_bias, ca_wo_ref[...], Ts)

    # residual 2: feed forward  linear -> relu -> linear
    h = _layernorm(x, norm_ref[2, 0], norm_ref[2, 1])
    ff = jnp.maximum(
        jnp.dot(h, ff_w1_ref[...], preferred_element_type=jnp.float32)
        + ff_b1_ref[...], 0.0)
    ff = jnp.dot(ff, ff_w2_ref[...], preferred_element_type=jnp.float32) \
        + ff_b2_ref[...]

    # single end-of-kernel store (keeps the store slot quiet on v5e)
    out_ref[...] = x + ff


# ---------------------------------------------------------------------------
# one-time parameter / mask preparation (hoisted out of the per-call path)
# ---------------------------------------------------------------------------
def prepare_decoder_params(params):
    """Fuse QKV / KV projection weights and fold 1/sqrt(d_k) into the Q weights.
    Call ONCE at parameter-load time, not per forward call."""
    (sa_wq, sa_wk, sa_wv, sa_wo,
     ca_wq, ca_wk, ca_wv, ca_wo,
     ff_w1, ff_b1, ff_w2, ff_b2) = params
    sa_wqkv = jnp.concatenate([sa_wq * SCALE, sa_wk, sa_wv], axis=1)  # (D, 3D)
    ca_wkv = jnp.concatenate([ca_wk, ca_wv], axis=1)                  # (D, 2D)
    return (sa_wqkv, sa_wo, ca_wq * SCALE, ca_wkv, ca_wo,
            ff_w1, ff_b1, ff_w2, ff_b2)


def prepare_masks(src_mask, tgt_mask):
    """Additive mask biases: s + (1-mask)*(-1e9)  ==  masked_fill within fp32 eps.
    Call ONCE per mask pattern."""
    return (1.0 - src_mask) * MASK_VALUE, (1.0 - tgt_mask) * MASK_VALUE


def _default_batch_block(B):
    # v7x has 2 TensorCores per chip -> one grid step per core (bb = ceil(B/2))
    # so the "parallel" axis splits across cores with no redundant steps.
    # Single-TC chips (v5e/v6e) fold the whole batch into one step to remove
    # per-step grid overhead.  Cap bb to bound trace-time unrolling.
    try:
        kind = jax.devices()[0].device_kind.lower()
    except Exception:
        kind = ""
    n_cores = 2 if "v7" in kind else 1
    bb = (B + n_cores - 1) // n_cores
    bb = max(1, min(bb, 8))
    while B % bb:
        bb -= 1
    return bb


# ---------------------------------------------------------------------------
# wrapper (expects prepared weights / masks)
# ---------------------------------------------------------------------------
def decoder_block(x, enc, src_bias, tgt_bias, prepared_weights, norm_params,
                  batch_block=None):
    (sa_wqkv, sa_wo, ca_wq, ca_wkv, ca_wo,
     ff_w1, ff_b1, ff_w2, ff_b2) = prepared_weights

    B, T, D = x.shape
    Ts = enc.shape[1]

    bb = _default_batch_block(B) if batch_block is None else batch_block
    if B % bb != 0:
        bb = 1
    grid = (B // bb,)

    # flatten batch into the sublane axis so bb can be folded without any
    # in-kernel reshape/relayout
    x2 = x.reshape(B * T, D)
    enc2 = enc.reshape(B * Ts, D)

    weights = [sa_wqkv, sa_wo, ca_wq, ca_wkv, ca_wo, ff_w1, ff_b1, ff_w2, ff_b2]

    def rep(shape):
        nd = len(shape)
        return pl.BlockSpec(shape, lambda i, _nd=nd: (0,) * _nd)

    in_specs = (
        [pl.BlockSpec((bb * T, D), lambda i: (i, 0)),      # x  (bb rows-of-T per step)
         pl.BlockSpec((bb * Ts, D), lambda i: (i, 0)),     # encoder output
         rep((T, T)),                                      # tgt mask bias
         rep((T, Ts))]                                     # src mask bias
        + [rep(w.shape) for w in weights]                  # fused weights / biases
        + [pl.BlockSpec(memory_space=pltpu.MemorySpace.SMEM)]  # (3,2) LN scalars
    )
    out_spec = pl.BlockSpec((bb * T, D), lambda i: (i, 0))

    kernel = functools.partial(decoder_block_kernel, bb=bb, T=T, Ts=Ts)

    out2 = pl.pallas_call(
        kernel,
        out_shape=jax.ShapeDtypeStruct((B * T, D), jnp.float32),
        grid_spec=pltpu.PrefetchScalarGridSpec(
            num_scalar_prefetch=0,
            grid=grid,
            in_specs=in_specs,
            out_specs=out_spec,
            scratch_shapes=[pltpu.VMEM((bb * T, D), jnp.float32)],  # shared attn scratch
        ),
        # TODO(synk): on v7x verify the 2-TC split actually engages with
        # "parallel"; switch to pltpu.CORE_PARALLEL / pl.core_map if it doesn't.
        compiler_params=pltpu.CompilerParams(dimension_semantics=("parallel",)),
    )(x2, enc2, tgt_bias, src_bias, *weights, norm_params)

    return out2.reshape(B, T, D)


# ---------------------------------------------------------------------------
# pure-JAX reference (torch-faithful math, no Pallas) for a correctness check
# ---------------------------------------------------------------------------
def decoder_block_ref(x, enc, src_mask, tgt_mask, params, norm):
    (sa_wq, sa_wk, sa_wv, sa_wo,
     ca_wq, ca_wk, ca_wv, ca_wo,
     ff_w1, ff_b1, ff_w2, ff_b2) = params

    def ln(xb, alpha, bias):
        mean = jnp.mean(xb, -1, keepdims=True)
        var = jnp.sum((xb - mean) ** 2, -1, keepdims=True) / (xb.shape[-1] - 1)
        return alpha * (xb - mean) / (jnp.sqrt(var) + EPS) + bias

    def mha(q_in, kv_in, wq, wk, wv, wo, mask):
        q = q_in @ wq
        k = kv_in @ wk
        v = kv_in @ wv
        heads = []
        for h in range(N_HEADS):
            sl = slice(h * D_K, (h + 1) * D_K)
            s = (q[:, sl] @ k[:, sl].T) * SCALE
            s = jnp.where(mask == 0.0, MASK_VALUE, s)
            s = s - jnp.max(s, -1, keepdims=True)
            e = jnp.exp(s)
            p = e / jnp.sum(e, -1, keepdims=True)
            heads.append(p @ v[:, sl])
        return jnp.concatenate(heads, -1) @ wo

    def one(xb, encb):
        h0 = ln(xb, norm[0, 0], norm[0, 1])
        y = xb + mha(h0, h0, sa_wq, sa_wk, sa_wv, sa_wo, tgt_mask)
        h1 = ln(y, norm[1, 0], norm[1, 1])
        y = y + mha(h1, encb, ca_wq, ca_wk, ca_wv, ca_wo, src_mask)
        h2 = ln(y, norm[2, 0], norm[2, 1])
        ff = jnp.maximum(h2 @ ff_w1 + ff_b1, 0.0) @ ff_w2 + ff_b2
        return y + ff

    return jax.vmap(one)(x, enc)


if __name__ == "__main__":
    B, T, TS = 2, 8, 8
    key = jax.random.PRNGKey(0)
    keys = jax.random.split(key, 16)

    x = jax.random.normal(keys[0], (B, T, D_MODEL), jnp.float32)
    enc = jax.random.normal(keys[1], (B, TS, D_MODEL), jnp.float32)

    # causal target mask; source mask hides the last two encoder positions
    tgt_mask = jnp.tril(jnp.ones((T, T), jnp.float32))
    src_mask = jnp.ones((T, TS), jnp.float32).at[:, TS - 2:].set(0.0)

    def init(k, shape):
        return 0.02 * jax.random.normal(k, shape, jnp.float32)

    params = [
        init(keys[2], (D_MODEL, D_MODEL)),   # self-attn w_q
        init(keys[3], (D_MODEL, D_MODEL)),   # self-attn w_k
        init(keys[4], (D_MODEL, D_MODEL)),   # self-attn w_v
        init(keys[5], (D_MODEL, D_MODEL)),   # self-attn w_o
        init(keys[6], (D_MODEL, D_MODEL)),   # cross-attn w_q
        init(keys[7], (D_MODEL, D_MODEL)),   # cross-attn w_k
        init(keys[8], (D_MODEL, D_MODEL)),   # cross-attn w_v
        init(keys[9], (D_MODEL, D_MODEL)),   # cross-attn w_o
        init(keys[10], (D_MODEL, D_FF)),     # ffn linear_1 weight
        init(keys[11], (1, D_FF)),           # ffn linear_1 bias
        init(keys[12], (D_FF, D_MODEL)),     # ffn linear_2 weight
        init(keys[13], (1, D_MODEL)),        # ffn linear_2 bias
    ]
    # LayerNormalization params: alpha=ones(1), bias=zeros(1), one per residual
    norm_params = jnp.tile(jnp.array([[1.0, 0.0]], jnp.float32), (3, 1))  # (3, 2)

    # one-time prep (weight fusion, scale folding, mask bias) -- hoisted from
    # the per-call path
    prepared = prepare_decoder_params(params)
    src_bias, tgt_bias = prepare_masks(src_mask, tgt_mask)

    out = decoder_block(x, enc, src_bias, tgt_bias, prepared, norm_params)
    out = jax.block_until_ready(out)

    ref = decoder_block_ref(x, enc, src_mask, tgt_mask, params, norm_params)
    assert out.shape == (B, T, D_MODEL)
    # approx (EUP) reciprocal in the softmax denominator -> slightly looser tol
    assert jnp.allclose(out, ref, atol=2e-3, rtol=2e-3), "mismatch vs JAX reference"

    print("KERNEL_OK")
</pallas_src>

<mosaic_0001>
module attributes {stable_mosaic.version = 11 : i64} {
  func.func @decoder_block_kernel(%arg0: i32, %arg1: memref<16x32xf32, #tpu.memory_space<vmem>>, %arg2: memref<16x32xf32, #tpu.memory_space<vmem>>, %arg3: memref<8x8xf32, #tpu.memory_space<vmem>>, %arg4: memref<8x8xf32, #tpu.memory_space<vmem>>, %arg5: memref<32x96xf32, #tpu.memory_space<vmem>>, %arg6: memref<32x32xf32, #tpu.memory_space<vmem>>, %arg7: memref<32x32xf32, #tpu.memory_space<vmem>>, %arg8: memref<32x64xf32, #tpu.memory_space<vmem>>, %arg9: memref<32x32xf32, #tpu.memory_space<vmem>>, %arg10: memref<32x64xf32, #tpu.memory_space<vmem>>, %arg11: memref<1x64xf32, #tpu.memory_space<vmem>>, %arg12: memref<64x32xf32, #tpu.memory_space<vmem>>, %arg13: memref<1x32xf32, #tpu.memory_space<vmem>>, %arg14: memref<3x2xf32, #tpu.memory_space<smem>>, %arg15: memref<16x32xf32, #tpu.memory_space<vmem>>, %arg16: memref<16x32xf32, #tpu.memory_space<vmem>>) attributes {dimension_semantics = [#tpu.dimension_semantics<parallel>], iteration_bounds = array<i64: 1>, scalar_prefetch = 0 : i64, scratch_operands = 1 : i64, tpu.core_type = #tpu.core_type<tc>, window_params = [{transform_indices = @transform_0, window_bounds = array<i64: 16, 32>}, {transform_indices = @transform_1, window_bounds = array<i64: 16, 32>}, {pipeline_mode = #tpu.pipeline_mode<synchronous>, transform_indices = @transform_2, window_bounds = array<i64: 8, 8>}, {pipeline_mode = #tpu.pipeline_mode<synchronous>, transform_indices = @transform_3, window_bounds = array<i64: 8, 8>}, {pipeline_mode = #tpu.pipeline_mode<synchronous>, transform_indices = @transform_4, window_bounds = array<i64: 32, 96>}, {pipeline_mode = #tpu.pipeline_mode<synchronous>, transform_indices = @transform_5, window_bounds = array<i64: 32, 32>}, {pipeline_mode = #tpu.pipeline_mode<synchronous>, transform_indices = @transform_6, window_bounds = array<i64: 32, 32>}, {pipeline_mode = #tpu.pipeline_mode<synchronous>, transform_indices = @transform_7, window_bounds = array<i64: 32, 64>}, {pipeline_mode = #tpu.pipeline_mode<synchronous>, transform_indices = @transform_8, window_bounds = array<i64: 32, 32>}, {pipeline_mode = #tpu.pipeline_mode<synchronous>, transform_indices = @transform_9, window_bounds = array<i64: 32, 64>}, {pipeline_mode = #tpu.pipeline_mode<synchronous>, transform_indices = @transform_10, window_bounds = array<i64: 1, 64>}, {pipeline_mode = #tpu.pipeline_mode<synchronous>, transform_indices = @transform_11, window_bounds = array<i64: 64, 32>}, {pipeline_mode = #tpu.pipeline_mode<synchronous>, transform_indices = @transform_12, window_bounds = array<i64: 1, 32>}, {transform_indices = @transform_13, window_bounds = array<i64: 3, 2>}, {transform_indices = @transform_14, window_bounds = array<i64: 16, 32>}]} {
    %c0 = arith.constant 0 : index
    %c0_0 = arith.constant 0 : index
    %0 = vector.load %arg1[%c0, %c0_0] : memref<16x32xf32, #tpu.memory_space<vmem>>, vector<16x32xf32>
    %c0_1 = arith.constant 0 : index
    %c0_2 = arith.constant 0 : index
    %1 = vector.load %arg2[%c0_1, %c0_2] : memref<16x32xf32, #tpu.memory_space<vmem>>, vector<16x32xf32>
    %c0_3 = arith.constant 0 : index
    %c0_4 = arith.constant 0 : index
    %2 = vector.load %arg3[%c0_3, %c0_4] : memref<8x8xf32, #tpu.memory_space<vmem>>, vector<8x8xf32>
    %c0_5 = arith.constant 0 : index
    %c0_6 = arith.constant 0 : index
    %3 = vector.load %arg4[%c0_5, %c0_6] : memref<8x8xf32, #tpu.memory_space<vmem>>, vector<8x8xf32>
    %c0_7 = arith.constant 0 : index
    %c0_8 = arith.constant 0 : index
    %4 = memref.load %arg14[%c0_7, %c0_8] : memref<3x2xf32, #tpu.memory_space<smem>>
    %c0_9 = arith.constant 0 : index
    %c1 = arith.constant 1 : index
    %5 = memref.load %arg14[%c0_9, %c1] : memref<3x2xf32, #tpu.memory_space<smem>>
    %cst = arith.constant dense<0.000000e+00> : vector<16xf32>
    %6 = vector.multi_reduction <add>, %0, %cst [1] : vector<16x32xf32> to vector<16xf32>
    %7 = vector.shape_cast %6 : vector<16xf32> to vector<16x1xf32>
    %cst_10 = arith.constant 3.200000e+01 : f32
    %8 = vector.broadcast %cst_10 : f32 to vector<16x1xf32>
    %9 = arith.divf %7, %8 : vector<16x1xf32>
    %10 = vector.broadcast %9 : vector<16x1xf32> to vector<16x32xf32>
    %11 = arith.subf %0, %10 : vector<16x32xf32>
    %12 = arith.mulf %11, %11 : vector<16x32xf32>
    %cst_11 = arith.constant dense<0.000000e+00> : vector<16xf32>
    %13 = vector.multi_reduction <add>, %12, %cst_11 [1] : vector<16x32xf32> to vector<16xf32>
    %14 = vector.shape_cast %13 : vector<16xf32> to vector<16x1xf32>
    %cst_12 = arith.constant 3.100000e+01 : f32
    %15 = vector.broadcast %cst_12 : f32 to vector<16x1xf32>
    %16 = arith.divf %14, %15 : vector<16x1xf32>
    %17 = vector.broadcast %9 : vector<16x1xf32> to vector<16x32xf32>
    %18 = arith.subf %0, %17 : vector<16x32xf32>
    %19 = vector.broadcast %4 : f32 to vector<16x32xf32>
    %20 = arith.mulf %19, %18 : vector<16x32xf32>
    %21 = math.sqrt %16 : vector<16x1xf32>
    %cst_13 = arith.constant 9.99999997E-7 : f32
    %22 = vector.broadcast %cst_13 : f32 to vector<16x1xf32>
    %23 = arith.addf %21, %22 : vector<16x1xf32>
    %24 = vector.broadcast %23 : vector<16x1xf32> to vector<16x32xf32>
    %25 = arith.divf %20, %24 : vector<16x32xf32>
    %26 = vector.broadcast %5 : f32 to vector<16x32xf32>
    %27 = arith.addf %25, %26 : vector<16x32xf32>
    %c0_14 = arith.constant 0 : index
    %c0_15 = arith.constant 0 : index
    %28 = vector.load %arg5[%c0_14, %c0_15] : memref<32x96xf32, #tpu.memory_space<vmem>>, vector<32x96xf32>
    %cst_16 = arith.constant dense<0.000000e+00> : vector<16x96xf32>
    %29 = tpu.matmul %27, %28, %cst_16 {dimension_numbers = #tpu.dot_dimension_numbers<[1], [0], [0], [1], [0, 0, 1, 1], [], []>} : vector<16x32xf32>, vector<32x96xf32>, vector<16x96xf32> -> vector<16x96xf32>
    %30 = vector.extract_strided_slice %29 {offsets = [0, 0], sizes = [16, 32], strides = [1, 1]} : vector<16x96xf32> to vector<16x32xf32>
    %31 = vector.extract_strided_slice %29 {offsets = [0, 32], sizes = [16, 32], strides = [1, 1]} : vector<16x96xf32> to vector<16x32xf32>
    %32 = vector.extract_strided_slice %29 {offsets = [0, 64], sizes = [16, 32], strides = [1, 1]} : vector<16x96xf32> to vector<16x32xf32>
    %c0_17 = arith.constant 0 : index
    %c0_18 = arith.constant 0 : index
    %33 = vector.load %arg6[%c0_17, %c0_18] : memref<32x32xf32, #tpu.memory_space<vmem>>, vector<32x32xf32>
    %34 = vector.extract_strided_slice %30 {offsets = [0, 0], sizes = [8, 32], strides = [1, 1]} : vector<16x32xf32> to vector<8x32xf32>
    %35 = vector.extract_strided_slice %31 {offsets = [0, 0], sizes = [8, 32], strides = [1, 1]} : vector<16x32xf32> to vector<8x32xf32>
    %36 = vector.extract_strided_slice %32 {offsets = [0, 0], sizes = [8, 32], strides = [1, 1]} : vector<16x32xf32> to vector<8x32xf32>
    %37 = vector.extract_strided_slice %34 {offsets = [0, 0], sizes = [8, 8], strides = [1, 1]} : vector<8x32xf32> to vector<8x8xf32>
    %38 = vector.extract_strided_slice %35 {offsets = [0, 0], sizes = [8, 8], strides = [1, 1]} : vector<8x32xf32> to vector<8x8xf32>
    %cst_19 = arith.constant dense<0.000000e+00> : vector<8x8xf32>
    %39 = tpu.matmul %37, %38, %cst_19 {dimension_numbers = #tpu.dot_dimension_numbers<[1], [1], [0], [0], [0, 0, 1, 0], [], []>} : vector<8x8xf32>, vector<8x8xf32>, vector<8x8xf32> -> vector<8x8xf32>
    %40 = arith.addf %39, %2 : vector<8x8xf32>
    %cst_20 = arith.constant dense<0xFF800000> : vector<8xf32>
    %41 = vector.multi_reduction <maximumf>, %40, %cst_20 [1] : vector<8x8xf32> to vector<8xf32>
    %42 = vector.shape_cast %41 : vector<8xf32> to vector<8x1xf32>
    %43 = vector.broadcast %42 : vector<8x1xf32> to vector<8x8xf32>
    %44 = arith.subf %40, %43 : vector<8x8xf32>
    %45 = math.exp %44 : vector<8x8xf32>
    %cst_21 = arith.constant dense<0.000000e+00> : vector<8xf32>
    %46 = vector.multi_reduction <add>, %45, %cst_21 [1] : vector<8x8xf32> to vector<8xf32>
    %47 = vector.shape_cast %46 : vector<8xf32> to vector<8x1xf32>
    %48 = tpu.reciprocal %47 {approx = true} : vector<8x1xf32> -> vector<8x1xf32>
    %49 = vector.broadcast %48 : vector<8x1xf32> to vector<8x8xf32>
    %50 = arith.mulf %45, %49 : vector<8x8xf32>
    %51 = vector.extract_strided_slice %36 {offsets = [0, 0], sizes = [8, 8], strides = [1, 1]} : vector<8x32xf32> to vector<8x8xf32>
    %cst_22 = arith.constant dense<0.000000e+00> : vector<8x8xf32>
    %52 = tpu.matmul %50, %51, %cst_22 {dimension_numbers = #tpu.dot_dimension_numbers<[1], [0], [0], [1], [0, 0, 1, 1], [], []>} : vector<8x8xf32>, vector<8x8xf32>, vector<8x8xf32> -> vector<8x8xf32>
    %c0_23 = arith.constant 0 : index
    %c0_24 = arith.constant 0 : index
    %53 = vector.load %arg16[%c0_23, %c0_24] : memref<16x32xf32, #tpu.memory_space<vmem>>, vector<8x8xf32>
    tpu.vector_store %arg16[%c0_23, %c0_24], %52 {strides = array<i32>} : memref<16x32xf32, #tpu.memory_space<vmem>>, vector<8x8xf32>,
    %54 = vector.extract_strided_slice %34 {offsets = [0, 8], sizes = [8, 8], strides = [1, 1]} : vector<8x32xf32> to vector<8x8xf32>
    %55 = vector.extract_strided_slice %35 {offsets = [0, 8], sizes = [8, 8], strides = [1, 1]} : vector<8x32xf32> to vector<8x8xf32>
    %cst_25 = arith.constant dense<0.000000e+00> : vector<8x8xf32>
    %56 = tpu.matmul %54, %55, %cst_25 {dimension_numbers = #tpu.dot_dimension_numbers<[1], [1], [0], [0], [0, 0, 1, 0], [], []>} : vector<8x8xf32>, vector<8x8xf32>, vector<8x8xf32> -> vector<8x8xf32>
    %57 = arith.addf %56, %2 : vector<8x8xf32>
    %cst_26 = arith.constant dense<0xFF800000> : vector<8xf32>
    %58 = vector.multi_reduction <maximumf>, %57, %cst_26 [1] : vector<8x8xf32> to vector<8xf32>
    %59 = vector.shape_cast %58 : vector<8xf32> to vector<8x1xf32>
    %60 = vector.broadcast %59 : vector<8x1xf32> to vector<8x8xf32>
    %61 = arith.subf %57, %60 : vector<8x8xf32>
    %62 = math.exp %61 : vector<8x8xf32>
    %cst_27 = arith.constant dense<0.000000e+00> : vector<8xf32>
    %63 = vector.multi_reduction <add>, %62, %cst_27 [1] : vector<8x8xf32> to vector<8xf32>
    %64 = vector.shape_cast %63 : vector<8xf32> to vector<8x1xf32>
    %65 = tpu.reciprocal %64 {approx = true} : vector<8x1xf32> -> vector<8x1xf32>
    %66 = vector.broadcast %65 : vector<8x1xf32> to vector<8x8xf32>
    %67 = arith.mulf %62, %66 : vector<8x8xf32>
    %68 = vector.extract_strided_slice %36 {offsets = [0, 8], sizes = [8, 8], strides = [1, 1]} : vector<8x32xf32> to vector<8x8xf32>
    %cst_28 = arith.constant dense<0.000000e+00> : vector<8x8xf32>
    %69 = tpu.matmul %67, %68, %cst_28 {dimension_numbers = #tpu.dot_dimension_numbers<[1], [0], [0], [1], [0, 0, 1, 1], [], []>} : vector<8x8xf32>, vector<8x8xf32>, vector<8x8xf32> -> vector<8x8xf32>
    %c0_29 = arith.constant 0 : index
    %c8 = arith.constant 8 : index
    %70 = vector.load %arg16[%c0_29, %c8] : memref<16x32xf32, #tpu.memory_space<vmem>>, vector<8x8xf32>
    tpu.vector_store %arg16[%c0_29, %c8], %69 {strides = array<i32>} : memref<16x32xf32, #tpu.memory_space<vmem>>, vector<8x8xf32>,
    %71 = vector.extract_strided_slice %34 {offsets = [0, 16], sizes = [8, 8], strides = [1, 1]} : vector<8x32xf32> to vector<8x8xf32>
    %72 = vector.extract_strided_slice %35 {offsets = [0, 16], sizes = [8, 8], strides = [1, 1]} : vector<8x32xf32> to vector<8x8xf32>
    %cst_30 = arith.constant dense<0.000000e+00> : vector<8x8xf32>
    %73 = tpu.matmul %71, %72, %cst_30 {dimension_numbers = #tpu.dot_dimension_numbers<[1], [1], [0], [0], [0, 0, 1, 0], [], []>} : vector<8x8xf32>, vector<8x8xf32>, vector<8x8xf32> -> vector<8x8xf32>
    %74 = arith.addf %73, %2 : vector<8x8xf32>
    %cst_31 = arith.constant dense<0xFF800000> : vector<8xf32>
    %75 = vector.multi_reduction <maximumf>, %74, %cst_31 [1] : vector<8x8xf32> to vector<8xf32>
    %76 = vector.shape_cast %75 : vector<8xf32> to vector<8x1xf32>
    %77 = vector.broadcast %76 : vector<8x1xf32> to vector<8x8xf32>
    %78 = arith.subf %74, %77 : vector<8x8xf32>
    %79 = math.exp %78 : vector<8x8xf32>
    %cst_32 = arith.constant dense<0.000000e+00> : vector<8xf32>
    %80 = vector.multi_reduction <add>, %79, %cst_32 [1] : vector<8x8xf32> to vector<8xf32>
    %81 = vector.shape_cast %80 : vector<8xf32> to vector<8x1xf32>
    %82 = tpu.reciprocal %81 {approx = true} : vector<8x1xf32> -> vector<8x1xf32>
    %83 = vector.broadcast %82 : vector<8x1xf32> to vector<8x8xf32>
    %84 = arith.mulf %79, %83 : vector<8x8xf32>
    %85 = vector.extract_strided_slice %36 {offsets = [0, 16], sizes = [8, 8], strides = [1, 1]} : vector<8x32xf32> to vector<8x8xf32>
    %cst_33 = arith.constant dense<0.000000e+00> : vector<8x8xf32>
    %86 = tpu.matmul %84, %85, %cst_33 {dimension_numbers = #tpu.dot_dimension_numbers<[1], [0], [0], [1], [0, 0, 1, 1], [], []>} : vector<8x8xf32>, vector<8x8xf32>, vector<8x8xf32> -> vector<8x8xf32>
    %c0_34 = arith.constant 0 : index
    %c16 = arith.constant 16 : index
    %87 = vector.load %arg16[%c0_34, %c16] : memref<16x32xf32, #tpu.memory_space<vmem>>, vector<8x8xf32>
    tpu.vector_store %arg16[%c0_34, %c16], %86 {strides = array<i32>} : memref<16x32xf32, #tpu.memory_space<vmem>>, vector<8x8xf32>,
    %88 = vector.extract_strided_slice %34 {offsets = [0, 24], sizes = [8, 8], strides = [1, 1]} : vector<8x32xf32> to vector<8x8xf32>
    %89 = vector.extract_strided_slice %35 {offsets = [0, 24], sizes = [8, 8], strides = [1, 1]} : vector<8x32xf32> to vector<8x8xf32>
    %cst_35 = arith.constant dense<0.000000e+00> : vector<8x8xf32>
    %90 = tpu.matmul %88, %89, %cst_35 {dimension_numbers = #tpu.dot_dimension_numbers<[1], [1], [0], [0], [0, 0, 1, 0], [], []>} : vector<8x8xf32>, vector<8x8xf32>, vector<8x8xf32> -> vector<8x8xf32>
    %91 = arith.addf %90, %2 : vector<8x8xf32>
    %cst_36 = arith.constant dense<0xFF800000> : vector<8xf32>
    %92 = vector.multi_reduction <maximumf>, %91, %cst_36 [1] : vector<8x8xf32> to vector<8xf32>
    %93 = vector.shape_cast %92 : vector<8xf32> to vector<8x1xf32>
    %94 = vector.broadcast %93 : vector<8x1xf32> to vector<8x8xf32>
    %95 = arith.subf %91, %94 : vector<8x8xf32>
    %96 = math.exp %95 : vector<8x8xf32>
    %cst_37 = arith.constant dense<0.000000e+00> : vector<8xf32>
    %97 = vector.multi_reduction <add>, %96, %cst_37 [1] : vector<8x8xf32> to vector<8xf32>
    %98 = vector.shape_cast %97 : vector<8xf32> to vector<8x1xf32>
    %99 = tpu.reciprocal %98 {approx = true} : vector<8x1xf32> -> vector<8x1xf32>
    %100 = vector.broadcast %99 : vector<8x1xf32> to vector<8x8xf32>
    %101 = arith.mulf %96, %100 : vector<8x8xf32>
    %102 = vector.extract_strided_slice %36 {offsets = [0, 24], sizes = [8, 8], strides = [1, 1]} : vector<8x32xf32> to vector<8x8xf32>
    %cst_38 = arith.constant dense<0.000000e+00> : vector<8x8xf32>
    %103 = tpu.matmul %101, %102, %cst_38 {dimension_numbers = #tpu.dot_dimension_numbers<[1], [0], [0], [1], [0, 0, 1, 1], [], []>} : vector<8x8xf32>, vector<8x8xf32>, vector<8x8xf32> -> vector<8x8xf32>
    %c0_39 = arith.constant 0 : index
    %c24 = arith.constant 24 : index
    %104 = vector.load %arg16[%c0_39, %c24] : memref<16x32xf32, #tpu.memory_space<vmem>>, vector<8x8xf32>
    tpu.vector_store %arg16[%c0_39, %c24], %103 {strides = array<i32>} : memref<16x32xf32, #tpu.memory_space<vmem>>, vector<8x8xf32>,
    %105 = vector.extract_strided_slice %30 {offsets = [8, 0], sizes = [8, 32], strides = [1, 1]} : vector<16x32xf32> to vector<8x32xf32>
    %106 = vector.extract_strided_slice %31 {offsets = [8, 0], sizes = [8, 32], strides = [1, 1]} : vector<16x32xf32> to vector<8x32xf32>
    %107 = vector.extract_strided_slice %32 {offsets = [8, 0], sizes = [8, 32], strides = [1, 1]} : vector<16x32xf32> to vector<8x32xf32>
    %108 = vector.extract_strided_slice %105 {offsets = [0, 0], sizes = [8, 8], strides = [1, 1]} : vector<8x32xf32> to vector<8x8xf32>
    %109 = vector.extract_strided_slice %106 {offsets = [0, 0], sizes = [8, 8], strides = [1, 1]} : vector<8x32xf32> to vector<8x8xf32>
    %cst_40 = arith.constant dense<0.000000e+00> : vector<8x8xf32>
    %110 = tpu.matmul %108, %109, %cst_40 {dimension_numbers = #tpu.dot_dimension_numbers<[1], [1], [0], [0], [0, 0, 1, 0], [], []>} : vector<8x8xf32>, vector<8x8xf32>, vector<8x8xf32> -> vector<8x8xf32>
    %111 = arith.addf %110, %2 : vector<8x8xf32>
    %cst_41 = arith.constant dense<0xFF800000> : vector<8xf32>
    %112 = vector.multi_reduction <maximumf>, %111, %cst_41 [1] : vector<8x8xf32> to vector<8xf32>
    %113 = vector.shape_cast %112 : vector<8xf32> to vector<8x1xf32>
    %114 = vector.broadcast %113 : vector<8x1xf32> to vector<8x8xf32>
    %115 = arith.subf %111, %114 : vector<8x8xf32>
    %116 = math.exp %115 : vector<8x8xf32>
    %cst_42 = arith.constant dense<0.000000e+00> : vector<8xf32>
    %117 = vector.multi_reduction <add>, %116, %cst_42 [1] : vector<8x8xf32> to vector<8xf32>
    %118 = vector.shape_cast %117 : vector<8xf32> to vector<8x1xf32>
    %119 = tpu.reciprocal %118 {approx = true} : vector<8x1xf32> -> vector<8x1xf32>
    %120 = vector.broadcast %119 : vector<8x1xf32> to vector<8x8xf32>
    %121 = arith.mulf %116, %120 : vector<8x8xf32>
    %122 = vector.extract_strided_slice %107 {offsets = [0, 0], sizes = [8, 8], strides = [1, 1]} : vector<8x32xf32> to vector<8x8xf32>
    %cst_43 = arith.constant dense<0.000000e+00> : vector<8x8xf32>
    %123 = tpu.matmul %121, %122, %cst_43 {dimension_numbers = #tpu.dot_dimension_numbers<[1], [0], [0], [1], [0, 0, 1, 1], [], []>} : vector<8x8xf32>, vector<8x8xf32>, vector<8x8xf32> -> vector<8x8xf32>
    %c8_44 = arith.constant 8 : index
    %c0_45 = arith.constant 0 : index
    %124 = vector.load %arg16[%c8_44, %c0_45] : memref<16x32xf32, #tpu.memory_space<vmem>>, vector<8x8xf32>
    tpu.vector_store %arg16[%c8_44, %c0_45], %123 {strides = array<i32>} : memref<16x32xf32, #tpu.memory_space<vmem>>, vector<8x8xf32>,
    %125 = vector.extract_strided_slice %105 {offsets = [0, 8], sizes = [8, 8], strides = [1, 1]} : vector<8x32xf32> to vector<8x8xf32>
    %126 = vector.extract_strided_slice %106 {offsets = [0, 8], sizes = [8, 8], strides = [1, 1]} : vector<8x32xf32> to vector<8x8xf32>
    %cst_46 = arith.constant dense<0.000000e+00> : vector<8x8xf32>
    %127 = tpu.matmul %125, %126, %cst_46 {dimension_numbers = #tpu.dot_dimension_numbers<[1], [1], [0], [0], [0, 0, 1, 0], [], []>} : vector<8x8xf32>, vector<8x8xf32>, vector<8x8xf32> -> vector<8x8xf32>
    %128 = arith.addf %127, %2 : vector<8x8xf32>
    %cst_47 = arith.constant dense<0xFF800000> : vector<8xf32>
    %129 = vector.multi_reduction <maximumf>, %128, %cst_47 [1] : vector<8x8xf32> to vector<8xf32>
    %130 = vector.shape_cast %129 : vector<8xf32> to vector<8x1xf32>
    %131 = vector.broadcast %130 : vector<8x1xf32> to vector<8x8xf32>
    %132 = arith.subf %128, %131 : vector<8x8xf32>
    %133 = math.exp %132 : vector<8x8xf32>
    %cst_48 = arith.constant dense<0.000000e+00> : vector<8xf32>
    %134 = vector.multi_reduction <add>, %133, %cst_48 [1] : vector<8x8xf32> to vector<8xf32>
    %135 = vector.shape_cast %134 : vector<8xf32> to vector<8x1xf32>
    %136 = tpu.reciprocal %135 {approx = true} : vector<8x1xf32> -> vector<8x1xf32>
    %137 = vector.broadcast %136 : vector<8x1xf32> to vector<8x8xf32>
    %138 = arith.mulf %133, %137 : vector<8x8xf32>
    %139 = vector.extract_strided_slice %107 {offsets = [0, 8], sizes = [8, 8], strides = [1, 1]} : vector<8x32xf32> to vector<8x8xf32>
    %cst_49 = arith.constant dense<0.000000e+00> : vector<8x8xf32>
    %140 = tpu.matmul %138, %139, %cst_49 {dimension_numbers = #tpu.dot_dimension_numbers<[1], [0], [0], [1], [0, 0, 1, 1], [], []>} : vector<8x8xf32>, vector<8x8xf32>, vector<8x8xf32> -> vector<8x8xf32>
    %c8_50 = arith.constant 8 : index
    %c8_51 = arith.constant 8 : index
    %141 = vector.load %arg16[%c8_50, %c8_51] : memref<16x32xf32, #tpu.memory_space<vmem>>, vector<8x8xf32>
    tpu.vector_store %arg16[%c8_50, %c8_51], %140 {strides = array<i32>} : memref<16x32xf32, #tpu.memory_space<vmem>>, vector<8x8xf32>,
    %142 = vector.extract_strided_slice %105 {offsets = [0, 16], sizes = [8, 8], strides = [1, 1]} : vector<8x32xf32> to vector<8x8xf32>
    %143 = vector.extract_strided_slice %106 {offsets = [0, 16], sizes = [8, 8], strides = [1, 1]} : vector<8x32xf32> to vector<8x8xf32>
    %cst_52 = arith.constant dense<0.000000e+00> : vector<8x8xf32>
    %144 = tpu.matmul %142, %143, %cst_52 {dimension_numbers = #tpu.dot_dimension_numbers<[1], [1], [0], [0], [0, 0, 1, 0], [], []>} : vector<8x8xf32>, vector<8x8xf32>, vector<8x8xf32> -> vector<8x8xf32>
    %145 = arith.addf %144, %2 : vector<8x8xf32>
    %cst_53 = arith.constant dense<0xFF800000> : vector<8xf32>
    %146 = vector.multi_reduction <maximumf>, %145, %cst_53 [1] : vector<8x8xf32> to vector<8xf32>
    %147 = vector.shape_cast %146 : vector<8xf32> to vector<8x1xf32>
    %148 = vector.broadcast %147 : vector<8x1xf32> to vector<8x8xf32>
    %149 = arith.subf %145, %148 : vector<8x8xf32>
    %150 = math.exp %149 : vector<8x8xf32>
    %cst_54 = arith.constant dense<0.000000e+00> : vector<8xf32>
    %151 = vector.multi_reduction <add>, %150, %cst_54 [1] : vector<8x8xf32> to vector<8xf32>
    %152 = vector.shape_cast %151 : vector<8xf32> to vector<8x1xf32>
    %153 = tpu.reciprocal %152 {approx = true} : vector<8x1xf32> -> vector<8x1xf32>
    %154 = vector.broadcast %153 : vector<8x1xf32> to vector<8x8xf32>
    %155 = arith.mulf %150, %154 : vector<8x8xf32>
    %156 = vector.extract_strided_slice %107 {offsets = [0, 16], sizes = [8, 8], strides = [1, 1]} : vector<8x32xf32> to vector<8x8xf32>
    %cst_55 = arith.constant dense<0.000000e+00> : vector<8x8xf32>
    %157 = tpu.matmul %155, %156, %cst_55 {dimension_numbers = #tpu.dot_dimension_numbers<[1], [0], [0], [1], [0, 0, 1, 1], [], []>} : vector<8x8xf32>, vector<8x8xf32>, vector<8x8xf32> -> vector<8x8xf32>
    %c8_56 = arith.constant 8 : index
    %c16_57 = arith.constant 16 : index
    %158 = vector.load %arg16[%c8_56, %c16_57] : memref<16x32xf32, #tpu.memory_space<vmem>>, vector<8x8xf32>
    tpu.vector_store %arg16[%c8_56, %c16_57], %157 {strides = array<i32>} : memref<16x32xf32, #tpu.memory_space<vmem>>, vector<8x8xf32>,
    %159 = vector.extract_strided_slice %105 {offsets = [0, 24], sizes = [8, 8], strides = [1, 1]} : vector<8x32xf32> to vector<8x8xf32>
    %160 = vector.extract_strided_slice %106 {offsets = [0, 24], sizes = [8, 8], strides = [1, 1]} : vector<8x32xf32> to vector<8x8xf32>
    %cst_58 = arith.constant dense<0.000000e+00> : vector<8x8xf32>
    %161 = tpu.matmul %159, %160, %cst_58 {dimension_numbers = #tpu.dot_dimension_numbers<[1], [1], [0], [0], [0, 0, 1, 0], [], []>} : vector<8x8xf32>, vector<8x8xf32>, vector<8x8xf32> -> vector<8x8xf32>
    %162 = arith.addf %161, %2 : vector<8x8xf32>
    %cst_59 = arith.constant dense<0xFF800000> : vector<8xf32>
    %163 = vector.multi_reduction <maximumf>, %162, %cst_59 [1] : vector<8x8xf32> to vector<8xf32>
    %164 = vector.shape_cast %163 : vector<8xf32> to vector<8x1xf32>
    %165 = vector.broadcast %164 : vector<8x1xf32> to vector<8x8xf32>
    %166 = arith.subf %162, %165 : vector<8x8xf32>
    %167 = math.exp %166 : vector<8x8xf32>
    %cst_60 = arith.constant dense<0.000000e+00> : vector<8xf32>
    %168 = vector.multi_reduction <add>, %167, %cst_60 [1] : vector<8x8xf32> to vector<8xf32>
    %169 = vector.shape_cast %168 : vector<8xf32> to vector<8x1xf32>
    %170 = tpu.reciprocal %169 {approx = true} : vector<8x1xf32> -> vector<8x1xf32>
    %171 = vector.broadcast %170 : vector<8x1xf32> to vector<8x8xf32>
    %172 = arith.mulf %167, %171 : vector<8x8xf32>
    %173 = vector.extract_strided_slice %107 {offsets = [0, 24], sizes = [8, 8], strides = [1, 1]} : vector<8x32xf32> to vector<8x8xf32>
    %cst_61 = arith.constant dense<0.000000e+00> : vector<8x8xf32>
    %174 = tpu.matmul %172, %173, %cst_61 {dimension_numbers = #tpu.dot_dimension_numbers<[1], [0], [0], [1], [0, 0, 1, 1], [], []>} : vector<8x8xf32>, vector<8x8xf32>, vector<8x8xf32> -> vector<8x8xf32>
    %c8_62 = arith.constant 8 : index
    %c24_63 = arith.constant 24 : index
    %175 = vector.load %arg16[%c8_62, %c24_63] : memref<16x32xf32, #tpu.memory_space<vmem>>, vector<8x8xf32>
    tpu.vector_store %arg16[%c8_62, %c24_63], %174 {strides = array<i32>} : memref<16x32xf32, #tpu.memory_space<vmem>>, vector<8x8xf32>,
    %c0_64 = arith.constant 0 : index
    %c0_65 = arith.constant 0 : index
    %176 = vector.load %arg16[%c0_64, %c0_65] : memref<16x32xf32, #tpu.memory_space<vmem>>, vector<16x32xf32>
    %cst_66 = arith.constant dense<0.000000e+00> : vector<16x32xf32>
    %177 = tpu.matmul %176, %33, %cst_66 {dimension_numbers = #tpu.dot_dimension_numbers<[1], [0], [0], [1], [0, 0, 1, 1], [], []>} : vector<16x32xf32>, vector<32x32xf32>, vector<16x32xf32> -> vector<16x32xf32>
    %178 = arith.addf %0, %177 : vector<16x32xf32>
    %c1_67 = arith.constant 1 : index
    %c0_68 = arith.constant 0 : index
    %179 = memref.load %arg14[%c1_67, %c0_68] : memref<3x2xf32, #tpu.memory_space<smem>>
    %c1_69 = arith.constant 1 : index
    %c1_70 = arith.constant 1 : index
    %180 = memref.load %arg14[%c1_69, %c1_70] : memref<3x2xf32, #tpu.memory_space<smem>>
    %cst_71 = arith.constant dense<0.000000e+00> : vector<16xf32>
    %181 = vector.multi_reduction <add>, %178, %cst_71 [1] : vector<16x32xf32> to vector<16xf32>
    %182 = vector.shape_cast %181 : vector<16xf32> to vector<16x1xf32>
    %cst_72 = arith.constant 3.200000e+01 : f32
    %183 = vector.broadcast %cst_72 : f32 to vector<16x1xf32>
    %184 = arith.divf %182, %183 : vector<16x1xf32>
    %185 = vector.broadcast %184 : vector<16x1xf32> to vector<16x32xf32>
    %186 = arith.subf %178, %185 : vector<16x32xf32>
    %187 = arith.mulf %186, %186 : vector<16x32xf32>
    %cst_73 = arith.constant dense<0.000000e+00> : vector<16xf32>
    %188 = vector.multi_reduction <add>, %187, %cst_73 [1] : vector<16x32xf32> to vector<16xf32>
    %189 = vector.shape_cast %188 : vector<16xf32> to vector<16x1xf32>
    %cst_74 = arith.constant 3.100000e+01 : f32
    %190 = vector.broadcast %cst_74 : f32 to vector<16x1xf32>
    %191 = arith.divf %189, %190 : vector<16x1xf32>
    %192 = vector.broadcast %184 : vector<16x1xf32> to vector<16x32xf32>
    %193 = arith.subf %178, %192 : vector<16x32xf32>
    %194 = vector.broadcast %179 : f32 to vector<16x32xf32>
    %195 = arith.mulf %194, %193 : vector<16x32xf32>
    %196 = math.sqrt %191 : vector<16x1xf32>
    %cst_75 = arith.constant 9.99999997E-7 : f32
    %197 = vector.broadcast %cst_75 : f32 to vector<16x1xf32>
    %198 = arith.addf %196, %197 : vector<16x1xf32>
    %199 = vector.broadcast %198 : vector<16x1xf32> to vector<16x32xf32>
    %200 = arith.divf %195, %199 : vector<16x32xf32>
    %201 = vector.broadcast %180 : f32 to vector<16x32xf32>
    %202 = arith.addf %200, %201 : vector<16x32xf32>
    %c0_76 = arith.constant 0 : index
    %c0_77 = arith.constant 0 : index
    %203 = vector.load %arg7[%c0_76, %c0_77] : memref<32x32xf32, #tpu.memory_space<vmem>>, vector<32x32xf32>
    %cst_78 = arith.constant dense<0.000000e+00> : vector<16x32xf32>
    %204 = tpu.matmul %202, %203, %cst_78 {dimension_numbers = #tpu.dot_dimension_numbers<[1], [0], [0], [1], [0, 0, 1, 1], [], []>} : vector<16x32xf32>, vector<32x32xf32>, vector<16x32xf32> -> vector<16x32xf32>
    %c0_79 = arith.constant 0 : index
    %c0_80 = arith.constant 0 : index
    %205 = vector.load %arg8[%c0_79, %c0_80] : memref<32x64xf32, #tpu.memory_space<vmem>>, vector<32x64xf32>
    %cst_81 = arith.constant dense<0.000000e+00> : vector<16x64xf32>
    %206 = tpu.matmul %1, %205, %cst_81 {dimension_numbers = #tpu.dot_dimension_numbers<[1], [0], [0], [1], [0, 0, 1, 1], [], []>} : vector<16x32xf32>, vector<32x64xf32>, vector<16x64xf32> -> vector<16x64xf32>
    %207 = vector.extract_strided_slice %206 {offsets = [0, 0], sizes = [16, 32], strides = [1, 1]} : vector<16x64xf32> to vector<16x32xf32>
    %208 = vector.extract_strided_slice %206 {offsets = [0, 32], sizes = [16, 32], strides = [1, 1]} : vector<16x64xf32> to vector<16x32xf32>
    %c0_82 = arith.constant 0 : index
    %c0_83 = arith.constant 0 : index
    %209 = vector.load %arg9[%c0_82, %c0_83] : memref<32x32xf32, #tpu.memory_space<vmem>>, vector<32x32xf32>
    %210 = vector.extract_strided_slice %204 {offsets = [0, 0], sizes = [8, 32], strides = [1, 1]} : vector<16x32xf32> to vector<8x32xf32>
    %211 = vector.extract_strided_slice %207 {offsets = [0, 0], sizes = [8, 32], strides = [1, 1]} : vector<16x32xf32> to vector<8x32xf32>
    %212 = vector.extract_strided_slice %208 {offsets = [0, 0], sizes = [8, 32], strides = [1, 1]} : vector<16x32xf32> to vector<8x32xf32>
    %213 = vector.extract_strided_slice %210 {offsets = [0, 0], sizes = [8, 8], strides = [1, 1]} : vector<8x32xf32> to vector<8x8xf32>
    %214 = vector.extract_strided_slice %211 {offsets = [0, 0], sizes = [8, 8], strides = [1, 1]} : vector<8x32xf32> to vector<8x8xf32>
    %cst_84 = arith.constant dense<0.000000e+00> : vector<8x8xf32>
    %215 = tpu.matmul %213, %214, %cst_84 {dimension_numbers = #tpu.dot_dimension_numbers<[1], [1], [0], [0], [0, 0, 1, 0], [], []>} : vector<8x8xf32>, vector<8x8xf32>, vector<8x8xf32> -> vector<8x8xf32>
    %216 = arith.addf %215, %3 : vector<8x8xf32>
    %cst_85 = arith.constant dense<0xFF800000> : vector<8xf32>
    %217 = vector.multi_reduction <maximumf>, %216, %cst_85 [1] : vector<8x8xf32> to vector<8xf32>
    %218 = vector.shape_cast %217 : vector<8xf32> to vector<8x1xf32>
    %219 = vector.broadcast %218 : vector<8x1xf32> to vector<8x8xf32>
    %220 = arith.subf %216, %219 : vector<8x8xf32>
    %221 = math.exp %220 : vector<8x8xf32>
    %cst_86 = arith.constant dense<0.000000e+00> : vector<8xf32>
    %222 = vector.multi_reduction <add>, %221, %cst_86 [1] : vector<8x8xf32> to vector<8xf32>
    %223 = vector.shape_cast %222 : vector<8xf32> to vector<8x1xf32>
    %224 = tpu.reciprocal %223 {approx = true} : vector<8x1xf32> -> vector<8x1xf32>
    %225 = vector.broadcast %224 : vector<8x1xf32> to vector<8x8xf32>
    %226 = arith.mulf %221, %225 : vector<8x8xf32>
    %227 = vector.extract_strided_slice %212 {offsets = [0, 0], sizes = [8, 8], strides = [1, 1]} : vector<8x32xf32> to vector<8x8xf32>
    %cst_87 = arith.constant dense<0.000000e+00> : vector<8x8xf32>
    %228 = tpu.matmul %226, %227, %cst_87 {dimension_numbers = #tpu.dot_dimension_numbers<[1], [0], [0], [1], [0, 0, 1, 1], [], []>} : vector<8x8xf32>, vector<8x8xf32>, vector<8x8xf32> -> vector<8x8xf32>
    %c0_88 = arith.constant 0 : index
    %c0_89 = arith.constant 0 : index
    %229 = vector.load %arg16[%c0_88, %c0_89] : memref<16x32xf32, #tpu.memory_space<vmem>>, vector<8x8xf32>
    tpu.vector_store %arg16[%c0_88, %c0_89], %228 {strides = array<i32>} : memref<16x32xf32, #tpu.memory_space<vmem>>, vector<8x8xf32>,
    %230 = vector.extract_strided_slice %210 {offsets = [0, 8], sizes = [8, 8], strides = [1, 1]} : vector<8x32xf32> to vector<8x8xf32>
    %231 = vector.extract_strided_slice %211 {offsets = [0, 8], sizes = [8, 8], strides = [1, 1]} : vector<8x32xf32> to vector<8x8xf32>
    %cst_90 = arith.constant dense<0.000000e+00> : vector<8x8xf32>
    %232 = tpu.matmul %230, %231, %cst_90 {dimension_numbers = #tpu.dot_dimension_numbers<[1], [1], [0], [0], [0, 0, 1, 0], [], []>} : vector<8x8xf32>, vector<8x8xf32>, vector<8x8xf32> -> vector<8x8xf32>
    %233 = arith.addf %232, %3 : vector<8x8xf32>
    %cst_91 = arith.constant dense<0xFF800000> : vector<8xf32>
    %234 = vector.multi_reduction <maximumf>, %233, %cst_91 [1] : vector<8x8xf32> to vector<8xf32>
    %235 = vector.shape_cast %234 : vector<8xf32> to vector<8x1xf32>
    %236 = vector.broadcast %235 : vector<8x1xf32> to vector<8x8xf32>
    %237 = arith.subf %233, %236 : vector<8x8xf32>
    %238 = math.exp %237 : vector<8x8xf32>
    %cst_92 = arith.constant dense<0.000000e+00> : vector<8xf32>
    %239 = vector.multi_reduction <add>, %238, %cst_92 [1] : vector<8x8xf32> to vector<8xf32>
    %240 = vector.shape_cast %239 : vector<8xf32> to vector<8x1xf32>
    %241 = tpu.reciprocal %240 {approx = true} : vector<8x1xf32> -> vector<8x1xf32>
    %242 = vector.broadcast %241 : vector<8x1xf32> to vector<8x8xf32>
    %243 = arith.mulf %238, %242 : vector<8x8xf32>
    %244 = vector.extract_strided_slice %212 {offsets = [0, 8], sizes = [8, 8], strides = [1, 1]} : vector<8x32xf32> to vector<8x8xf32>
    %cst_93 = arith.constant dense<0.000000e+00> : vector<8x8xf32>
    %245 = tpu.matmul %243, %244, %cst_93 {dimension_numbers = #tpu.dot_dimension_numbers<[1], [0], [0], [1], [0, 0, 1, 1], [], []>} : vector<8x8xf32>, vector<8x8xf32>, vector<8x8xf32> -> vector<8x8xf32>
    %c0_94 = arith.constant 0 : index
    %c8_95 = arith.constant 8 : index
    %246 = vector.load %arg16[%c0_94, %c8_95] : memref<16x32xf32, #tpu.memory_space<vmem>>, vector<8x8xf32>
    tpu.vector_store %arg16[%c0_94, %c8_95], %245 {strides = array<i32>} : memref<16x32xf32, #tpu.memory_space<vmem>>, vector<8x8xf32>,
    %247 = vector.extract_strided_slice %210 {offsets = [0, 16], sizes = [8, 8], strides = [1, 1]} : vector<8x32xf32> to vector<8x8xf32>
    %248 = vector.extract_strided_slice %211 {offsets = [0, 16], sizes = [8, 8], strides = [1, 1]} : vector<8x32xf32> to vector<8x8xf32>
    %cst_96 = arith.constant dense<0.000000e+00> : vector<8x8xf32>
    %249 = tpu.matmul %247, %248, %cst_96 {dimension_numbers = #tpu.dot_dimension_numbers<[1], [1], [0], [0], [0, 0, 1, 0], [], []>} : vector<8x8xf32>, vector<8x8xf32>, vector<8x8xf32> -> vector<8x8xf32>
    %250 = arith.addf %249, %3 : vector<8x8xf32>
    %cst_97 = arith.constant dense<0xFF800000> : vector<8xf32>
    %251 = vector.multi_reduction <maximumf>, %250, %cst_97 [1] : vector<8x8xf32> to vector<8xf32>
    %252 = vector.shape_cast %251 : vector<8xf32> to vector<8x1xf32>
    %253 = vector.broadcast %252 : vector<8x1xf32> to vector<8x8xf32>
    %254 = arith.subf %250, %253 : vector<8x8xf32>
    %255 = math.exp %254 : vector<8x8xf32>
    %cst_98 = arith.constant dense<0.000000e+00> : vector<8xf32>
    %256 = vector.multi_reduction <add>, %255, %cst_98 [1] : vector<8x8xf32> to vector<8xf32>
    %257 = vector.shape_cast %256 : vector<8xf32> to vector<8x1xf32>
    %258 = tpu.reciprocal %257 {approx = true} : vector<8x1xf32> -> vector<8x1xf32>
    %259 = vector.broadcast %258 : vector<8x1xf32> to vector<8x8xf32>
    %260 = arith.mulf %255, %259 : vector<8x8xf32>
    %261 = vector.extract_strided_slice %212 {offsets = [0, 16], sizes = [8, 8], strides = [1, 1]} : vector<8x32xf32> to vector<8x8xf32>
    %cst_99 = arith.constant dense<0.000000e+00> : vector<8x8xf32>
    %262 = tpu.matmul %260, %261, %cst_99 {dimension_numbers = #tpu.dot_dimension_numbers<[1], [0], [0], [1], [0, 0, 1, 1], [], []>} : vector<8x8xf32>, vector<8x8xf32>, vector<8x8xf32> -> vector<8x8xf32>
    %c0_100 = arith.constant 0 : index
    %c16_101 = arith.constant 16 : index
    %263 = vector.load %arg16[%c0_100, %c16_101] : memref<16x32xf32, #tpu.memory_space<vmem>>, vector<8x8xf32>
    tpu.vector_store %arg16[%c0_100, %c16_101], %262 {strides = array<i32>} : memref<16x32xf32, #tpu.memory_space<vmem>>, vector<8x8xf32>,
    %264 = vector.extract_strided_slice %210 {offsets = [0, 24], sizes = [8, 8], strides = [1, 1]} : vector<8x32xf32> to vector<8x8xf32>
    %265 = vector.extract_strided_slice %211 {offsets = [0, 24], sizes = [8, 8], strides = [1, 1]} : vector<8x32xf32> to vector<8x8xf32>
    %cst_102 = arith.constant dense<0.000000e+00> : vector<8x8xf32>
    %266 = tpu.matmul %264, %265, %cst_102 {dimension_numbers = #tpu.dot_dimension_numbers<[1], [1], [0], [0], [0, 0, 1, 0], [], []>} : vector<8x8xf32>, vector<8x8xf32>, vector<8x8xf32> -> vector<8x8xf32>
    %267 = arith.addf %266, %3 : vector<8x8xf32>
    %cst_103 = arith.constant dense<0xFF800000> : vector<8xf32>
    %268 = vector.multi_reduction <maximumf>, %267, %cst_103 [1] : vector<8x8xf32> to vector<8xf32>
    %269 = vector.shape_cast %268 : vector<8xf32> to vector<8x1xf32>
    %270 = vector.broadcast %269 : vector<8x1xf32> to vector<8x8xf32>
    %271 = arith.subf %267, %270 : vector<8x8xf32>
    %272 = math.exp %271 : vector<8x8xf32>
    %cst_104 = arith.constant dense<0.000000e+00> : vector<8xf32>
    %273 = vector.multi_reduction <add>, %272, %cst_104 [1] : vector<8x8xf32> to vector<8xf32>
    %274 = vector.shape_cast %273 : vector<8xf32> to vector<8x1xf32>
    %275 = tpu.reciprocal %274 {approx = true} : vector<8x1xf32> -> vector<8x1xf32>
    %276 = vector.broadcast %275 : vector<8x1xf32> to vector<8x8xf32>
    %277 = arith.mulf %272, %276 : vector<8x8xf32>
    %278 = vector.extract_strided_slice %212 {offsets = [0, 24], sizes = [8, 8], strides = [1, 1]} : vector<8x32xf32> to vector<8x8xf32>
    %cst_105 = arith.constant dense<0.000000e+00> : vector<8x8xf32>
    %279 = tpu.matmul %277, %278, %cst_105 {dimension_numbers = #tpu.dot_dimension_numbers<[1], [0], [0], [1], [0, 0, 1, 1], [], []>} : vector<8x8xf32>, vector<8x8xf32>, vector<8x8xf32> -> vector<8x8xf32>
    %c0_106 = arith.constant 0 : index
    %c24_107 = arith.constant 24 : index
    %280 = vector.load %arg16[%c0_106, %c24_107] : memref<16x32xf32, #tpu.memory_space<vmem>>, vector<8x8xf32>
    tpu.vector_store %arg16[%c0_106, %c24_107], %279 {strides = array<i32>} : memref<16x32xf32, #tpu.memory_space<vmem>>, vector<8x8xf32>,
    %281 = vector.extract_strided_slice %204 {offsets = [8, 0], sizes = [8, 32], strides = [1, 1]} : vector<16x32xf32> to vector<8x32xf32>
    %282 = vector.extract_strided_slice %207 {offsets = [8, 0], sizes = [8, 32], strides = [1, 1]} : vector<16x32xf32> to vector<8x32xf32>
    %283 = vector.extract_strided_slice %208 {offsets = [8, 0], sizes = [8, 32], strides = [1, 1]} : vector<16x32xf32> to vector<8x32xf32>
    %284 = vector.extract_strided_slice %281 {offsets = [0, 0], sizes = [8, 8], strides = [1, 1]} : vector<8x32xf32> to vector<8x8xf32>
    %285 = vector.extract_strided_slice %282 {offsets = [0, 0], sizes = [8, 8], strides = [1, 1]} : vector<8x32xf32> to vector<8x8xf32>
    %cst_108 = arith.constant dense<0.000000e+00> : vector<8x8xf32>
    %286 = tpu.matmul %284, %285, %cst_108 {dimension_numbers = #tpu.dot_dimension_numbers<[1], [1], [0], [0], [0, 0, 1, 0], [], []>} : vector<8x8xf32>, vector<8x8xf32>, vector<8x8xf32> -> vector<8x8xf32>
    %287 = arith.addf %286, %3 : vector<8x8xf32>
    %cst_109 = arith.constant dense<0xFF800000> : vector<8xf32>
    %288 = vector.multi_reduction <maximumf>, %287, %cst_109 [1] : vector<8x8xf32> to vector<8xf32>
    %289 = vector.shape_cast %288 : vector<8xf32> to vector<8x1xf32>
    %290 = vector.broadcast %289 : vector<8x1xf32> to vector<8x8xf32>
    %291 = arith.subf %287, %290 : vector<8x8xf32>
    %292 = math.exp %291 : vector<8x8xf32>
    %cst_110 = arith.constant dense<0.000000e+00> : vector<8xf32>
    %293 = vector.multi_reduction <add>, %292, %cst_110 [1] : vector<8x8xf32> to vector<8xf32>
    %294 = vector.shape_cast %293 : vector<8xf32> to vector<8x1xf32>
    %295 = tpu.reciprocal %294 {approx = true} : vector<8x1xf32> -> vector<8x1xf32>
    %296 = vector.broadcast %295 : vector<8x1xf32> to vector<8x8xf32>
    %297 = arith.mulf %292, %296 : vector<8x8xf32>
    %298 = vector.extract_strided_slice %283 {offsets = [0, 0], sizes = [8, 8], strides = [1, 1]} : vector<8x32xf32> to vector<8x8xf32>
    %cst_111 = arith.constant dense<0.000000e+00> : vector<8x8xf32>
    %299 = tpu.matmul %297, %298, %cst_111 {dimension_numbers = #tpu.dot_dimension_numbers<[1], [0], [0], [1], [0, 0, 1, 1], [], []>} : vector<8x8xf32>, vector<8x8xf32>, vector<8x8xf32> -> vector<8x8xf32>
    %c8_112 = arith.constant 8 : index
    %c0_113 = arith.constant 0 : index
    %300 = vector.load %arg16[%c8_112, %c0_113] : memref<16x32xf32, #tpu.memory_space<vmem>>, vector<8x8xf32>
    tpu.vector_store %arg16[%c8_112, %c0_113], %299 {strides = array<i32>} : memref<16x32xf32, #tpu.memory_space<vmem>>, vector<8x8xf32>,
    %301 = vector.extract_strided_slice %281 {offsets = [0, 8], sizes = [8, 8], strides = [1, 1]} : vector<8x32xf32> to vector<8x8xf32>
    %302 = vector.extract_strided_slice %282 {offsets = [0, 8], sizes = [8, 8], strides = [1, 1]} : vector<8x32xf32> to vector<8x8xf32>
    %cst_114 = arith.constant dense<0.000000e+00> : vector<8x8xf32>
    %303 = tpu.matmul %301, %302, %cst_114 {dimension_numbers = #tpu.dot_dimension_numbers<[1], [1], [0], [0], [0, 0, 1, 0], [], []>} : vector<8x8xf32>, vector<8x8xf32>, vector<8x8xf32> -> vector<8x8xf32>
    %304 = arith.addf %303, %3 : vector<8x8xf32>
    %cst_115 = arith.constant dense<0xFF800000> : vector<8xf32>
    %305 = vector.multi_reduction <maximumf>, %304, %cst_115 [1] : vector<8x8xf32> to vector<8xf32>
    %306 = vector.shape_cast %305 : vector<8xf32> to vector<8x1xf32>
    %307 = vector.broadcast %306 : vector<8x1xf32> to vector<8x8xf32>
    %308 = arith.subf %304, %307 : vector<8x8xf32>
    %309 = math.exp %308 : vector<8x8xf32>
    %cst_116 = arith.constant dense<0.000000e+00> : vector<8xf32>
    %310 = vector.multi_reduction <add>, %309, %cst_116 [1] : vector<8x8xf32> to vector<8xf32>
    %311 = vector.shape_cast %310 : vector<8xf32> to vector<8x1xf32>
    %312 = tpu.reciprocal %311 {approx = true} : vector<8x1xf32> -> vector<8x1xf32>
    %313 = vector.broadcast %312 : vector<8x1xf32> to vector<8x8xf32>
    %314 = arith.mulf %309, %313 : vector<8x8xf32>
    %315 = vector.extract_strided_slice %283 {offsets = [0, 8], sizes = [8, 8], strides = [1, 1]} : vector<8x32xf32> to vector<8x8xf32>
    %cst_117 = arith.constant dense<0.000000e+00> : vector<8x8xf32>
    %316 = tpu.matmul %314, %315, %cst_117 {dimension_numbers = #tpu.dot_dimension_numbers<[1], [0], [0], [1], [0, 0, 1, 1], [], []>} : vector<8x8xf32>, vector<8x8xf32>, vector<8x8xf32> -> vector<8x8xf32>
    %c8_118 = arith.constant 8 : index
    %c8_119 = arith.constant 8 : index
    %317 = vector.load %arg16[%c8_118, %c8_119] : memref<16x32xf32, #tpu.memory_space<vmem>>, vector<8x8xf32>
    tpu.vector_store %arg16[%c8_118, %c8_119], %316 {strides = array<i32>} : memref<16x32xf32, #tpu.memory_space<vmem>>, vector<8x8xf32>,
    %318 = vector.extract_strided_slice %281 {offsets = [0, 16], sizes = [8, 8], strides = [1, 1]} : vector<8x32xf32> to vector<8x8xf32>
    %319 = vector.extract_strided_slice %282 {offsets = [0, 16], sizes = [8, 8], strides = [1, 1]} : vector<8x32xf32> to vector<8x8xf32>
    %cst_120 = arith.constant dense<0.000000e+00> : vector<8x8xf32>
    %320 = tpu.matmul %318, %319, %cst_120 {dimension_numbers = #tpu.dot_dimension_numbers<[1], [1], [0], [0], [0, 0, 1, 0], [], []>} : vector<8x8xf32>, vector<8x8xf32>, vector<8x8xf32> -> vector<8x8xf32>
    %321 = arith.addf %320, %3 : vector<8x8xf32>
    %cst_121 = arith.constant dense<0xFF800000> : vector<8xf32>
    %322 = vector.multi_reduction <maximumf>, %321, %cst_121 [1] : vector<8x8xf32> to vector<8xf32>
    %323 = vector.shape_cast %322 : vector<8xf32> to vector<8x1xf32>
    %324 = vector.broadcast %323 : vector<8x1xf32> to vector<8x8xf32>
    %325 = arith.subf %321, %324 : vector<8x8xf32>
    %326 = math.exp %325 : vector<8x8xf32>
    %cst_122 = arith.constant dense<0.000000e+00> : vector<8xf32>
    %327 = vector.multi_reduction <add>, %326, %cst_122 [1] : vector<8x8xf32> to vector<8xf32>
    %328 = vector.shape_cast %327 : vector<8xf32> to vector<8x1xf32>
    %329 = tpu.reciprocal %328 {approx = true} : vector<8x1xf32> -> vector<8x1xf32>
    %330 = vector.broadcast %329 : vector<8x1xf32> to vector<8x8xf32>
    %331 = arith.mulf %326, %330 : vector<8x8xf32>
    %332 = vector.extract_strided_slice %283 {offsets = [0, 16], sizes = [8, 8], strides = [1, 1]} : vector<8x32xf32> to vector<8x8xf32>
    %cst_123 = arith.constant dense<0.000000e+00> : vector<8x8xf32>
    %333 = tpu.matmul %331, %332, %cst_123 {dimension_numbers = #tpu.dot_dimension_numbers<[1], [0], [0], [1], [0, 0, 1, 1], [], []>} : vector<8x8xf32>, vector<8x8xf32>, vector<8x8xf32> -> vector<8x8xf32>
    %c8_124 = arith.constant 8 : index
    %c16_125 = arith.constant 16 : index
    %334 = vector.load %arg16[%c8_124, %c16_125] : memref<16x32xf32, #tpu.memory_space<vmem>>, vector<8x8xf32>
    tpu.vector_store %arg16[%c8_124, %c16_125], %333 {strides = array<i32>} : memref<16x32xf32, #tpu.memory_space<vmem>>, vector<8x8xf32>,
    %335 = vector.extract_strided_slice %281 {offsets = [0, 24], sizes = [8, 8], strides = [1, 1]} : vector<8x32xf32> to vector<8x8xf32>
    %336 = vector.extract_strided_slice %282 {offsets = [0, 24], sizes = [8, 8], strides = [1, 1]} : vector<8x32xf32> to vector<8x8xf32>
    %cst_126 = arith.constant dense<0.000000e+00> : vector<8x8xf32>
    %337 = tpu.matmul %335, %336, %cst_126 {dimension_numbers = #tpu.dot_dimension_numbers<[1], [1], [0], [0], [0, 0, 1, 0], [], []>} : vector<8x8xf32>, vector<8x8xf32>, vector<8x8xf32> -> vector<8x8xf32>
    %338 = arith.addf %337, %3 : vector<8x8xf32>
    %cst_127 = arith.constant dense<0xFF800000> : vector<8xf32>
    %339 = vector.multi_reduction <maximumf>, %338, %cst_127 [1] : vector<8x8xf32> to vector<8xf32>
    %340 = vector.shape_cast %339 : vector<8xf32> to vector<8x1xf32>
    %341 = vector.broadcast %340 : vector<8x1xf32> to vector<8x8xf32>
    %342 = arith.subf %338, %341 : vector<8x8xf32>
    %343 = math.exp %342 : vector<8x8xf32>
    %cst_128 = arith.constant dense<0.000000e+00> : vector<8xf32>
    %344 = vector.multi_reduction <add>, %343, %cst_128 [1] : vector<8x8xf32> to vector<8xf32>
    %345 = vector.shape_cast %344 : vector<8xf32> to vector<8x1xf32>
    %346 = tpu.reciprocal %345 {approx = true} : vector<8x1xf32> -> vector<8x1xf32>
    %347 = vector.broadcast %346 : vector<8x1xf32> to vector<8x8xf32>
    %348 = arith.mulf %343, %347 : vector<8x8xf32>
    %349 = vector.extract_strided_slice %283 {offsets = [0, 24], sizes = [8, 8], strides = [1, 1]} : vector<8x32xf32> to vector<8x8xf32>
    %cst_129 = arith.constant dense<0.000000e+00> : vector<8x8xf32>
    %350 = tpu.matmul %348, %349, %cst_129 {dimension_numbers = #tpu.dot_dimension_numbers<[1], [0], [0], [1], [0, 0, 1, 1], [], []>} : vector<8x8xf32>, vector<8x8xf32>, vector<8x8xf32> -> vector<8x8xf32>
    %c8_130 = arith.constant 8 : index
    %c24_131 = arith.constant 24 : index
    %351 = vector.load %arg16[%c8_130, %c24_131] : memref<16x32xf32, #tpu.memory_space<vmem>>, vector<8x8xf32>
    tpu.vector_store %arg16[%c8_130, %c24_131], %350 {strides = array<i32>} : memref<16x32xf32, #tpu.memory_space<vmem>>, vector<8x8xf32>,
    %c0_132 = arith.constant 0 : index
    %c0_133 = arith.constant 0 : index
    %352 = vector.load %arg16[%c0_132, %c0_133] : memref<16x32xf32, #tpu.memory_space<vmem>>, vector<16x32xf32>
    %cst_134 = arith.constant dense<0.000000e+00> : vector<16x32xf32>
    %353 = tpu.matmul %352, %209, %cst_134 {dimension_numbers = #tpu.dot_dimension_numbers<[1], [0], [0], [1], [0, 0, 1, 1], [], []>} : vector<16x32xf32>, vector<32x32xf32>, vector<16x32xf32> -> vector<16x32xf32>
    %354 = arith.addf %178, %353 : vector<16x32xf32>
    %c2 = arith.constant 2 : index
    %c0_135 = arith.constant 0 : index
    %355 = memref.load %arg14[%c2, %c0_135] : memref<3x2xf32, #tpu.memory_space<smem>>
    %c2_136 = arith.constant 2 : index
    %c1_137 = arith.constant 1 : index
    %356 = memref.load %arg14[%c2_136, %c1_137] : memref<3x2xf32, #tpu.memory_space<smem>>
    %cst_138 = arith.constant dense<0.000000e+00> : vector<16xf32>
    %357 = vector.multi_reduction <add>, %354, %cst_138 [1] : vector<16x32xf32> to vector<16xf32>
    %358 = vector.shape_cast %357 : vector<16xf32> to vector<16x1xf32>
    %cst_139 = arith.constant 3.200000e+01 : f32
    %359 = vector.broadcast %cst_139 : f32 to vector<16x1xf32>
    %360 = arith.divf %358, %359 : vector<16x1xf32>
    %361 = vector.broadcast %360 : vector<16x1xf32> to vector<16x32xf32>
    %362 = arith.subf %354, %361 : vector<16x32xf32>
    %363 = arith.mulf %362, %362 : vector<16x32xf32>
    %cst_140 = arith.constant dense<0.000000e+00> : vector<16xf32>
    %364 = vector.multi_reduction <add>, %363, %cst_140 [1] : vector<16x32xf32> to vector<16xf32>
    %365 = vector.shape_cast %364 : vector<16xf32> to vector<16x1xf32>
    %cst_141 = arith.constant 3.100000e+01 : f32
    %366 = vector.broadcast %cst_141 : f32 to vector<16x1xf32>
    %367 = arith.divf %365, %366 : vector<16x1xf32>
    %368 = vector.broadcast %360 : vector<16x1xf32> to vector<16x32xf32>
    %369 = arith.subf %354, %368 : vector<16x32xf32>
    %370 = vector.broadcast %355 : f32 to vector<16x32xf32>
    %371 = arith.mulf %370, %369 : vector<16x32xf32>
    %372 = math.sqrt %367 : vector<16x1xf32>
    %cst_142 = arith.constant 9.99999997E-7 : f32
    %373 = vector.broadcast %cst_142 : f32 to vector<16x1xf32>
    %374 = arith.addf %372, %373 : vector<16x1xf32>
    %375 = vector.broadcast %374 : vector<16x1xf32> to vector<16x32xf32>
    %376 = arith.divf %371, %375 : vector<16x32xf32>
    %377 = vector.broadcast %356 : f32 to vector<16x32xf32>
    %378 = arith.addf %376, %377 : vector<16x32xf32>
    %c0_143 = arith.constant 0 : index
    %c0_144 = arith.constant 0 : index
    %379 = vector.load %arg10[%c0_143, %c0_144] : memref<32x64xf32, #tpu.memory_space<vmem>>, vector<32x64xf32>
    %cst_145 = arith.constant dense<0.000000e+00> : vector<16x64xf32>
    %380 = tpu.matmul %378, %379, %cst_145 {dimension_numbers = #tpu.dot_dimension_numbers<[1], [0], [0], [1], [0, 0, 1, 1], [], []>} : vector<16x32xf32>, vector<32x64xf32>, vector<16x64xf32> -> vector<16x64xf32>
    %c0_146 = arith.constant 0 : index
    %c0_147 = arith.constant 0 : index
    %381 = vector.load %arg11[%c0_146, %c0_147] : memref<1x64xf32, #tpu.memory_space<vmem>>, vector<1x64xf32>
    %382 = vector.broadcast %381 : vector<1x64xf32> to vector<16x64xf32>
    %383 = arith.addf %380, %382 : vector<16x64xf32>
    %cst_148 = arith.constant 0.000000e+00 : f32
    %384 = vector.broadcast %cst_148 : f32 to vector<16x64xf32>
    %385 = arith.maximumf %383, %384 : vector<16x64xf32>
    %c0_149 = arith.constant 0 : index
    %c0_150 = arith.constant 0 : index
    %386 = vector.load %arg12[%c0_149, %c0_150] : memref<64x32xf32, #tpu.memory_space<vmem>>, vector<64x32xf32>
    %cst_151 = arith.constant dense<0.000000e+00> : vector<16x32xf32>
    %387 = tpu.matmul %385, %386, %cst_151 {dimension_numbers = #tpu.dot_dimension_numbers<[1], [0], [0], [1], [0, 0, 1, 1], [], []>} : vector<16x64xf32>, vector<64x32xf32>, vector<16x32xf32> -> vector<16x32xf32>
    %c0_152 = arith.constant 0 : index
    %c0_153 = arith.constant 0 : index
    %388 = vector.load %arg13[%c0_152, %c0_153] : memref<1x32xf32, #tpu.memory_space<vmem>>, vector<1x32xf32>
    %389 = vector.broadcast %388 : vector<1x32xf32> to vector<16x32xf32>
    %390 = arith.addf %387, %389 : vector<16x32xf32>
    %391 = arith.addf %354, %390 : vector<16x32xf32>
    %c0_154 = arith.constant 0 : index
    %c0_155 = arith.constant 0 : index
    %392 = vector.load %arg15[%c0_154, %c0_155] : memref<16x32xf32, #tpu.memory_space<vmem>>, vector<16x32xf32>
    tpu.vector_store %arg15[%c0_154, %c0_155], %391 {strides = array<i32>} : memref<16x32xf32, #tpu.memory_space<vmem>>, vector<16x32xf32>,
    return
  }
  func.func @transform_0(%arg0: i32) -> (i32, i32) {
    %c0_i32 = arith.constant 0 : i32
    %c0_i32_0 = arith.constant 0 : i32
    return %arg0, %c0_i32 : i32, i32
  }
  func.func @transform_1(%arg0: i32) -> (i32, i32) {
    %c0_i32 = arith.constant 0 : i32
    %c0_i32_0 = arith.constant 0 : i32
    return %arg0, %c0_i32 : i32, i32
  }
  func.func @transform_2(%arg0: i32) -> (i32, i32) {
    %c0_i32 = arith.constant 0 : i32
    %c0_i32_0 = arith.constant 0 : i32
    %c0_i32_1 = arith.constant 0 : i32
    return %c0_i32, %c0_i32_0 : i32, i32
  }
  func.func @transform_3(%arg0: i32) -> (i32, i32) {
    %c0_i32 = arith.constant 0 : i32
    %c0_i32_0 = arith.constant 0 : i32
    %c0_i32_1 = arith.constant 0 : i32
    return %c0_i32, %c0_i32_0 : i32, i32
  }
  func.func @transform_4(%arg0: i32) -> (i32, i32) {
    %c0_i32 = arith.constant 0 : i32
    %c0_i32_0 = arith.constant 0 : i32
    %c0_i32_1 = arith.constant 0 : i32
    return %c0_i32, %c0_i32_0 : i32, i32
  }
  func.func @transform_5(%arg0: i32) -> (i32, i32) {
    %c0_i32 = arith.constant 0 : i32
    %c0_i32_0 = arith.constant 0 : i32
    %c0_i32_1 = arith.constant 0 : i32
    return %c0_i32, %c0_i32_0 : i32, i32
  }
  func.func @transform_6(%arg0: i32) -> (i32, i32) {
    %c0_i32 = arith.constant 0 : i32
    %c0_i32_0 = arith.constant 0 : i32
    %c0_i32_1 = arith.constant 0 : i32
    return %c0_i32, %c0_i32_0 : i32, i32
  }
  func.func @transform_7(%arg0: i32) -> (i32, i32) {
    %c0_i32 = arith.constant 0 : i32
    %c0_i32_0 = arith.constant 0 : i32
    %c0_i32_1 = arith.constant 0 : i32
    return %c0_i32, %c0_i32_0 : i32, i32
  }
  func.func @transform_8(%arg0: i32) -> (i32, i32) {
    %c0_i32 = arith.constant 0 : i32
    %c0_i32_0 = arith.constant 0 : i32
    %c0_i32_1 = arith.constant 0 : i32
    return %c0_i32, %c0_i32_0 : i32, i32
  }
  func.func @transform_9(%arg0: i32) -> (i32, i32) {
    %c0_i32 = arith.constant 0 : i32
    %c0_i32_0 = arith.constant 0 : i32
    %c0_i32_1 = arith.constant 0 : i32
    return %c0_i32, %c0_i32_0 : i32, i32
  }
  func.func @transform_10(%arg0: i32) -> (i32, i32) {
    %c0_i32 = arith.constant 0 : i32
    %c0_i32_0 = arith.constant 0 : i32
    %c0_i32_1 = arith.constant 0 : i32
    return %c0_i32, %c0_i32_0 : i32, i32
  }
  func.func @transform_11(%arg0: i32) -> (i32, i32) {
    %c0_i32 = arith.constant 0 : i32
    %c0_i32_0 = arith.constant 0 : i32
    %c0_i32_1 = arith.constant 0 : i32
    return %c0_i32, %c0_i32_0 : i32, i32
  }
  func.func @transform_12(%arg0: i32) -> (i32, i32) {
    %c0_i32 = arith.constant 0 : i32
    %c0_i32_0 = arith.constant 0 : i32
    %c0_i32_1 = arith.constant 0 : i32
    return %c0_i32, %c0_i32_0 : i32, i32
  }
  func.func @transform_13(%arg0: i32) -> (i32, i32) {
    %c0_i32 = arith.constant 0 : i32
    %c0_i32_0 = arith.constant 0 : i32
    %c0_i32_1 = arith.constant 0 : i32
    return %c0_i32, %c0_i32_0 : i32, i32
  }
  func.func @transform_14(%arg0: i32) -> (i32, i32) {
    %c0_i32 = arith.constant 0 : i32
    %c0_i32_0 = arith.constant 0 : i32
    return %arg0, %c0_i32 : i32, i32
  }
}

</mosaic_0001>

<bundles_post_ra>
// kernel: tpu_custom_call.1
= control target key start
LH: loop header
LB: loop body
LE: loop exit
PB: predicated region body
PF: predicated region fallthrough
CT: control target
= control target key end

     0   :  { %19 = vsyncpa [#allocation4], 0  ;;  %s2774_s0 = inlined_call_operand.hbm [shape: f32[16,32], index: 0, kind: input, shape index: {}]   ;;  %s2775_s1 = inlined_call_operand.hbm [shape: f32[16,32], index: 1, kind: input, shape index: {}]   ;;  %s2776_s2 = inlined_call_operand.hbm [shape: f32[8,8], index: 2, kind: input, shape index: {}]   ;;  %s2777_s3 = inlined_call_operand.hbm [shape: f32[8,8], index: 3, kind: input, shape index: {}]   ;;  %s2778_s4 = inlined_call_operand.vmem [shape: f32[32,96], index: 4, kind: input, shape index: {}]   ;;  %s2779_s5 = inlined_call_operand.vmem [shape: f32[32,32], index: 5, kind: input, shape index: {}]   ;;  %s2780_s6 = inlined_call_operand.vmem [shape: f32[32,32], index: 6, kind: input, shape index: {}]   ;;  %s2781_s7 = inlined_call_operand.hbm [shape: f32[32,64], index: 7, kind: input, shape index: {}]   ;;  %s2782_s8 = inlined_call_operand.hbm [shape: f32[32,32], index: 8, kind: input, shape index: {}]   ;;  %s2783_s9 = inlined_call_operand.hbm [shape: f32[32,64], index: 9, kind: input, shape index: {}]   ;;  %s2784_s10 = inlined_call_operand.vmem [shape: f32[1,64], index: 10, kind: input, shape index: {}]   ;;  %s2785_s11 = inlined_call_operand.vmem [shape: f32[64,32], index: 11, kind: input, shape index: {}]   ;;  %s2786_s12 = inlined_call_operand.vmem [shape: f32[1,32], index: 12, kind: input, shape index: {}]   ;;  %s2787_s13 = inlined_call_operand.vmem [shape: f32[3,2], index: 13, kind: input, shape index: {}]   ;;  %s2788_s14 = inlined_call_operand.hbm [shape: f32[16,32], index: 14, kind: output, shape index: {}]  }
   0x1   :  { %20 = vsyncpa [#allocation8], 0 }
   0x2   :  { %21 = vsyncpa [#allocation11], 0 }
   0x3   :  { %22 = vsyncpa [#allocation14], 0 }
   0x4   :  { %23 = vsyncpa [#allocation6], 0 }
   0x5   :  { %24 = vsyncpa [#allocation5], 0  ;;  %s42_s15 = sshll.u32 %s2775_s1, 4  ;;  %s2230_s16 = smov [#allocation7]   ;;  %s43_s15 = int_to_ptr.hbm [resolvable:$true] %s42_s15 }
   0x6   :  { %s44_s17 = sshll.u32 %s2230_s16, 4  ;;  %s67_s20 = sshll.u32 %s2777_s3, 4  ;;  %s45_s17 = int_to_ptr.vmem [resolvable:$true] %s44_s17  ;;  %s68_s20 = int_to_ptr.hbm [resolvable:$true] %s67_s20 }
   0x7   :  { %s2231_s21 = smov 128   ;;  %s2232_s22 = smov 8  }
   0x8   :  { %50 = dma.hbm_to_vmem [thread:$0]  %s43_s15, 256, %s45_s17, [#allocation8], %s2231_s21, %s2231_s21, %s2232_s22  }
   0x9   :  { %s2233_s23 = smov [#allocation10]   ;;  %s96_s1 = sshll.u32 %s2782_s8, 4  ;;  %s97_s1 = int_to_ptr.hbm [resolvable:$true] %s96_s1 }
   0xa   :  { %s69_s24 = sshll.u32 %s2233_s23, 4  ;;  %s29_s3 = sshll.u32 %s2774_s0, 4  ;;  %s70_s24 = int_to_ptr.vmem [resolvable:$true] %s69_s24  ;;  %s30_s3 = int_to_ptr.hbm [resolvable:$true] %s29_s3 }
   0xb   :  { %72 = dma.hbm_to_vmem [thread:$0]  %s68_s20, 128, %s70_s24, [#allocation11]  }
   0xc   :  { %s2234_s29 = smov [#allocation13]   ;;  %s2235_s15 = smov [#allocation3]  }
   0xd   :  { %s98_s30 = sshll.u32 %s2234_s29, 4  ;;  %s31_s16 = sshll.u32 %s2235_s15, 4  ;;  %s99_s30 = int_to_ptr.vmem [resolvable:$true] %s98_s30  ;;  %s32_s16 = int_to_ptr.vmem [resolvable:$true] %s31_s16 }
   0xe   :  { %104 = dma.hbm_to_vmem [thread:$0]  %s97_s1, 512, %s99_s30, [#allocation14], %s2231_s21, %s2231_s21, %s2232_s22  }
   0xf   :  { %s56_s8 = sshll.u32 %s2776_s2, 4  ;;  %s83_s20 = sshll.u32 %s2781_s7, 4  ;;  %s57_s8 = int_to_ptr.hbm [resolvable:$true] %s56_s8  ;;  %s84_s20 = int_to_ptr.hbm [resolvable:$true] %s83_s20 }
  0x10   :  { %37 = dma.hbm_to_vmem [thread:$0]  %s30_s3, 256, %s32_s16, [#allocation4], %s2231_s21, %s2231_s21, %s2232_s22  }
  0x11   :  { %s2236_s23 = smov [#allocation9]   ;;  %s2237_s25 = smov [#allocation12]  }
  0x12   :  { %s58_s24 = sshll.u32 %s2236_s23, 4  ;;  %s85_s26 = sshll.u32 %s2237_s25, 4  ;;  %s59_s24 = int_to_ptr.vmem [resolvable:$true] %s58_s24  ;;  %s86_s26 = int_to_ptr.vmem [resolvable:$true] %s85_s26 }
  0x13   :  { %61 = dma.hbm_to_vmem [thread:$0]  %s57_s8, 128, %s59_s24, [#allocation8]  }
  0x14   :  { %s109_s2 = sshll.u32 %s2783_s9, 4  ;;  %s129_s7 = sshll.u32 %s2787_s13, 4  ;;  %s110_s2 = int_to_ptr.hbm [resolvable:$true] %s109_s2  ;;  %s130_s7 = int_to_ptr.vmem [resolvable:$true] %s129_s7 }
  0x15   :  { %91 = dma.hbm_to_vmem [thread:$0]  %s84_s20, 512, %s86_s26, [#allocation11], %s2231_s21, %s2231_s21, %s2232_s22  }
  0x16   :  { %s2238_s29 = smov [#allocation15]   ;;  %s2239_s15 = smov [#allocation16]  }
  0x17   :  { %s111_s30 = sshll.u32 %s2238_s29, 4  ;;  %s112_s30 = int_to_ptr.vmem [resolvable:$true] %s111_s30 }
  0x18   :  { %117 = dma.hbm_to_vmem [thread:$0]  %s110_s2, 512, %s112_s30, [#allocation14], %s2231_s21, %s2231_s21, %s2232_s22  }
  0x19   :  { %132 = dma.vmem_to_smem %s130_s7, 64, %s2239_s15, [#allocation6]  }
  0x1a   :  { %2218 = dma.done.wait [#allocation4], 256  }
  0x1b   :  { %2219 = vsyncadd [#allocation4], 4294967040 }
  0x1c   :  { %2220 = dma.done.wait [#allocation8], 384  }
  0x1d   :  { %2221 = vsyncadd [#allocation8], 4294966912 }
  0x1e   :  { %2222 = dma.done.wait [#allocation11], 640  }
  0x1f   :  { %2223 = vsyncadd [#allocation11], 4294966656 }
  0x20   :  { %2224 = dma.done.wait [#allocation14], 1024  }
  0x21   :  { %2225 = vsyncadd [#allocation14], 4294966272 }
  0x22   :  { %2226 = dma.done.wait [#allocation6], 64  }
  0x23   :  { %2227 = vsyncadd [#allocation6], 4294967232 }
  0x24   :  { %165 = sfence }
  0x25   :  { %v2370_v0 = vld [vmem:[#allocation3] sm:$0xff]  ;;  %vm174_vm0 = vcmask 261120   ;;  %v2372_v1 = vld [vmem:[#allocation3 + $0x8] sm:$0xff]  ;;  %v2240_v4 = vmov 32.0   ;;  %v2241_v21 = vmov 31.0   ;;  %v272_v28 = vld [vmem:[%s2778_s4 + $0x8] sm:$0xff] }
  0x26   :  { %v175_v2 = vsel %vm174_vm0, %v2370_v0, 0.0  ;;  %v178_v3 = vsel %vm174_vm0, %v2372_v1, 0.0  ;;  %1922 = vrcp.f32 %v2240_v4  ;;  %v274_v25 = vld [vmem:[%s2778_s4 + $0x18] sm:$0xff]  ;;  %v273_v26 = vld [vmem:[%s2778_s4 + $0x10] sm:$0xff]  ;;  %v271_v29 = vld [vmem:[%s2778_s4] sm:$0xff]  ;;  %s2410_s4 = sld [smem:[#allocation16]] }
  0x27   :  { %176 = vadd.xlane.f32.xlu0 %v175_v2  ;;  %179 = vadd.xlane.f32.xlu1 %v178_v3  ;;  %1924 = vrcp.f32 %v2241_v21  ;;  %s2412_s20 = sld [smem:[#allocation16 + $0x1]]  ;;  %s2242_s23 = smov 80   ;;  %vm311_vm15 = vcmask 64512  }
  0x28   :  { %293 = vmatpush.msra.mxu0 %v274_v25  ;;  %s2243_s24 = smov 120   ;;  %s2244_s25 = smov 96  }
  0x29   :  { %s2245_s26 = smov 88   ;;  %s2246_s1 = smov 112  }
  0x2a   :  { %294 = vmatpush.msra.mxu0 %v273_v26  ;;  %s2247_s27 = smov 72   ;;  %s2248_s2 = smov 64  }
  0x2b   :  { %s2249_s28 = smov 56   ;;  %s2250_s3 = smov 48  }
  0x2c   :  { %v1923_v5 = vpop.eup %1922  ;;  %295 = vmatpush.msra.mxu0 %v272_v28  ;;  %v209_v62 = vstv %s2410_s4  ;;  %s2251_s7 = smov 104   ;;  %s2252_s29 = smov 40  }
  0x2d   :  { %v182_v6 = vmul.f32 32.0, %v1923_v5  ;;  %vm186_vm1 = vweird.f32 %v1923_v5  ;;  %v1925_v22 = vpop.eup %1924  ;;  %s2253_s30 = smov 16   ;;  %s2254_s15 = smov 24  }
  0x2e   :  { %v201_v23 = vmul.f32 31.0, %v1925_v22  ;;  %vm205_vm2 = vweird.f32 %v1925_v22  ;;  %296 = vmatpush.msra.mxu0 %v271_v29  ;;  %s2593_s13 = sld [smem:[#allocation16 + $0x80]] }
  0x2f   :  { %v183_v7 = vsub.f32 1.0, %v182_v6 }
  0x30   :  { %v202_v24 = vsub.f32 1.0, %v201_v23 }
  0x31   :  { %v184_v8 = vmul.f32 %v1923_v5, %v183_v7 }
  0x32   :  { %v203_v27 = vmul.f32 %v1925_v22, %v202_v24 }
  0x33   :  { %v185_v9 = vadd.f32 %v1923_v5, %v184_v8  ;;  %v268_v8 = vstv %s2412_s20 }
  0x34   :  { %v204_v30 = vadd.f32 %v1925_v22, %v203_v27 }
  0x35   :  { %v2378_v10 = vsel %vm186_vm1, %v1923_v5, %v185_v9  ;;  %vm443_vm1 = vcmask 130112  }
  0x36   :  { %v2406_v31 = vsel %vm205_vm2, %v1925_v22, %v204_v30  ;;  %vm514_vm2 = vcmask 195712  }
  0x9a   :  { %v177_v11 = vpop.xlane.xlu0 %176  ;;  %v180_v12 = vpop.xlane.xlu1 %179 }
  0x9b   :  { %v188_v13 = vmul.f32 %v2378_v10, %v177_v11  ;;  %v189_v14 = vmul.f32 %v2378_v10, %v180_v12 }
  0x9d   :  { %v2383_v15 = vsub.f32 %v2370_v0, %v188_v13  ;;  %v2386_v16 = vsub.f32 %v2372_v1, %v189_v14 }
  0x9f   :  { %v192_v17 = vmul.f32 %v2383_v15, %v2383_v15  ;;  %v193_v18 = vmul.f32 %v2386_v16, %v2386_v16  ;;  %v210_v5 = vmul.f32 %v209_v62, %v2383_v15  ;;  %v211_v15 = vmul.f32 %v209_v62, %v2386_v16 }
  0xa1   :  { %v194_v19 = vsel %vm174_vm0, %v192_v17, 0.0  ;;  %v197_v20 = vsel %vm174_vm0, %v193_v18, 0.0 }
  0xa2   :  { %195 = vadd.xlane.f32.xlu0 %v194_v19  ;;  %198 = vadd.xlane.f32.xlu1 %v197_v20 }
 0x115   :  { %v196_v32 = vpop.xlane.xlu0 %195  ;;  %v199_v38 = vpop.xlane.xlu1 %198 }
 0x116   :  { %v207_v33 = vmul.f32 %v2406_v31, %v196_v32  ;;  %v208_v40 = vmul.f32 %v2406_v31, %v199_v38  ;;  %v2439_v32 = vld [vmem:[#allocation9] sm:$0xff] }
 0x118   :  { %1926 = vrsqrt.f32 %v207_v33  ;;  %vm219_vm3 = vcmp.eq.f32.partialorder %v207_v33, inf  ;;  %v222_v43 = vand.u32 2147483648, %v207_v33  ;;  %vm221_vm4 = vcmp.eq.f32.partialorder %v207_v33, 0.0 }
 0x119   :  { %1928 = vrsqrt.f32 %v208_v40  ;;  %vm231_vm5 = vcmp.eq.f32.partialorder %v208_v40, inf  ;;  %v234_v55 = vand.u32 2147483648, %v208_v40  ;;  %vm233_vm6 = vcmp.eq.f32.partialorder %v208_v40, 0.0 }
 0x11e   :  { %v1927_v34 = vpop.eup %1926 }
 0x11f   :  { %v213_v35 = vmul.f32 %v1927_v34, %v207_v33  ;;  %v1929_v46 = vpop.eup %1928 }
 0x120   :  { %v225_v48 = vmul.f32 %v1929_v46, %v208_v40 }
 0x121   :  { %v214_v36 = vmul.f32 %v1927_v34, %v213_v35 }
 0x122   :  { %v226_v49 = vmul.f32 %v1929_v46, %v225_v48 }
 0x123   :  { %v215_v37 = vmul.f32 0.5, %v214_v36 }
 0x124   :  { %v227_v50 = vmul.f32 0.5, %v226_v49 }
 0x125   :  { %v216_v39 = vsub.f32 1.5, %v215_v37 }
 0x126   :  { %v228_v51 = vsub.f32 1.5, %v227_v50 }
 0x127   :  { %v217_v41 = vmul.f32 %v1927_v34, %v216_v39 }
 0x128   :  { %v229_v54 = vmul.f32 %v1929_v46, %v228_v51 }
 0x129   :  { %v218_v42 = vmul.f32 %v217_v41, %v207_v33 }
 0x12a   :  { %v230_v57 = vmul.f32 %v229_v54, %v208_v40 }
 0x12b   :  { %v220_v44 = vsel %vm219_vm3, %v207_v33, %v218_v42  ;;  %vm585_vm3 = vcmask 261312  }
 0x12c   :  { %v223_v45 = vsel %vm221_vm4, %v222_v43, %v220_v44  ;;  %v232_v61 = vsel %vm231_vm5, %v208_v40, %v230_v57 }
 0x12d   :  { %v236_v47 = vadd.f32 1e-06, %v223_v45  ;;  %v235_v63 = vsel %vm233_vm6, %v234_v55, %v232_v61 }
 0x12e   :  { %v237_v3 = vadd.f32 1e-06, %v235_v63 }
 0x12f   :  { %1930 = vrcp.f32 %v236_v47  ;;  %v249_v58 = vand.u32 2147483648, %v236_v47  ;;  %v247_v60 = vand.u32 2147483647, %v236_v47  ;;  %vm243_vm8 = vweird.f32 %v236_v47 }
 0x130   :  { %1932 = vrcp.f32 %v237_v3  ;;  %v264_v14 = vand.u32 2147483648, %v237_v3  ;;  %vm258_vm11 = vweird.f32 %v237_v3  ;;  %v262_v18 = vand.u32 2147483647, %v237_v3 }
 0x131   :  { %v250_v4 = vor.u32 1.1754944e-38, %v249_v58  ;;  %vm248_vm10 = vcmp.eq.f32.partialorder %v247_v60, 8.507059e+37 }
 0x132   :  { %v265_v20 = vor.u32 1.1754944e-38, %v264_v14  ;;  %vm263_vm14 = vcmp.eq.f32.partialorder %v262_v18, 8.507059e+37 }
 0x135   :  { %v1931_v52 = vpop.eup %1930 }
 0x136   :  { %v239_v53 = vmul.f32 %v1931_v52, %v236_v47  ;;  %vm244_vm7 = vweird.f32 %v1931_v52  ;;  %v1933_v12 = vpop.eup %1932 }
 0x137   :  { %vm245_vm9 = vmor %vm243_vm8, %vm244_vm7  ;;  %v254_v13 = vmul.f32 %v1933_v12, %v237_v3  ;;  %vm259_vm12 = vweird.f32 %v1933_v12 }
 0x138   :  { %v240_v56 = vsub.f32 1.0, %v239_v53  ;;  %vm260_vm13 = vmor %vm258_vm11, %vm259_vm12 }
 0x139   :  { %v255_v17 = vsub.f32 1.0, %v254_v13 }
 0x13a   :  { %v241_v59 = vmul.f32 %v1931_v52, %v240_v56 }
 0x13b   :  { %v256_v19 = vmul.f32 %v1933_v12, %v255_v17 }
 0x13c   :  { %v242_v2 = vadd.f32 %v1931_v52, %v241_v59 }
 0x13d   :  { %v257_v21 = vadd.f32 %v1933_v12, %v256_v19 }
 0x13e   :  { %v246_v6 = vsel %vm245_vm9, %v1931_v52, %v242_v2 }
 0x13f   :  { %v251_v7 = vsel %vm248_vm10, %v250_v4, %v246_v6  ;;  %v261_v22 = vsel %vm260_vm13, %v1933_v12, %v257_v21 }
 0x140   :  { %v252_v9 = vmul.f32 %v251_v7, %v210_v5  ;;  %v266_v23 = vsel %vm263_vm14, %v265_v20, %v261_v22 }
 0x141   :  { %v267_v24 = vmul.f32 %v266_v23, %v211_v15 }
 0x142   :  { %v269_v11 = vadd.f32 %v268_v8, %v252_v9 }
 0x143   :  { %v270_v25 = vadd.f32 %v268_v8, %v267_v24 }
 0x144   :  { %1823 = vmatmul.msk.f32.vlgmr.msra.gmra.mxu0 %vm174_vm0, %v269_v11 }
 0x14c   :  { %1824 = vmatmul.msk.f32.gmra.mxu0 %vm174_vm0, %v270_v25 }
 0x1c1   :  { %v2420_v26 = vpop.f32.mrf.mxu0 }
 0x1c2   :  { %447 = vrot.lane.b32.xlu1 %v2420_v26, %s2242_s23  ;;  %374 = vrot.lane.b32.xlu0 %v2420_v26, %s2243_s24 }
 0x1c3   :  { %309 = vrot.lane.b32.xlu2 %v2420_v26, %s2244_s25 }
 0x1c9   :  { %v2443_v36 = vpop.f32.mrf.mxu0 }
 0x1cb   :  { %376 = vrot.lane.b32.xlu2 %v2420_v26, %s2245_s26 }
 0x1d3   :  { %445 = vrot.lane.b32.xlu2 %v2420_v26, %s2246_s1 }
 0x21d   :  { %v310_v16 = vpop.permute.xlu2 %309 }
 0x21e   :  { %1825 = vmatpush.xpose.msk.msra.mxu1 %vm311_vm15, %v310_v16 }
 0x221   :  { %1826 = vmatmul.msk.f32.vlgmr.msra.gmra.mxu1 %vm311_vm15, %v2420_v26 }
 0x225   :  { %v377_v27 = vpop.permute.xlu2 %376 }
 0x226   :  { %1828 = vmatpush.xpose.msk.msrb.mxu0 %vm311_vm15, %v377_v27 }
 0x22d   :  { %v446_v30 = vpop.permute.xlu2 %445 }
 0x234   :  { %v448_v28 = vpop.permute.xlu1 %447  ;;  %v375_v29 = vpop.permute.xlu0 %374 }
 0x235   :  { %1829 = vmatmul.msk.f32.vlgmr.msrb.gmra.mxu0 %vm311_vm15, %v375_v29  ;;  %1831 = vmatpush.xpose.msk.msrb.mxu1 %vm311_vm15, %v448_v28 }
 0x238   :  { %1832 = vmatmul.msk.f32.vlgmr.msrb.gmra.mxu1 %vm311_vm15, %v446_v30 }
 0x29e   :  { %v333_v33 = vpop.f32.mrf.mxu1 }
 0x29f   :  { %v334_v34 = vadd.f32 %v333_v33, %v2439_v32 }
 0x2a1   :  { %v336_v35 = vsel %vm311_vm15, %v334_v34, -inf }
 0x2a2   :  { %337 = vmax.xlane.f32.xlu2 %v336_v35 }
 0x2b2   :  { %v399_v37 = vpop.f32.mrf.mxu0 }
 0x2b3   :  { %v400_v38 = vadd.f32 %v399_v37, %v2439_v32 }
 0x2b5   :  { %v470_v39 = vpop.f32.mrf.mxu1  ;;  %v402_v40 = vsel %vm311_vm15, %v400_v38, -inf }
 0x2b6   :  { %v471_v41 = vadd.f32 %v470_v39, %v2439_v32  ;;  %403 = vmax.xlane.f32.xlu0 %v402_v40 }
 0x2b8   :  { %v473_v42 = vsel %vm311_vm15, %v471_v41, -inf }
 0x2b9   :  { %474 = vmax.xlane.f32.xlu1 %v473_v42 }
 0x2ba   :  { %518 = vrot.lane.b32.xlu2 %v2420_v26, %s2247_s27 }
 0x2c2   :  { %654 = vrot.lane.b32.xlu2 %v2443_v36, %s2245_s26 }
 0x2ca   :  { %347 = vrot.lane.b32.xlu0 %v2420_v26, %s2248_s2 }
 0x2d2   :  { %413 = vrot.lane.b32.xlu1 %v2420_v26, %s2249_s28  ;;  %484 = vrot.lane.b32.xlu0 %v2420_v26, %s2250_s3 }
 0x2da   :  { %588 = vrot.lane.b32.xlu1 %v2443_v36, %s2244_s25  ;;  %516 = vrot.lane.b32.xlu0 %v2420_v26, %s2251_s7 }
 0x2e2   :  { %724 = vrot.lane.b32.xlu1 %v2443_v36, %s2242_s23  ;;  %652 = vrot.lane.b32.xlu0 %v2443_v36, %s2243_s24 }
 0x2ea   :  { %792 = vrot.lane.b32.xlu1 %v2443_v36, %s2251_s7  ;;  %722 = vrot.lane.b32.xlu0 %v2443_v36, %s2246_s1 }
 0x315   :  { %v338_v43 = vpop.xlane.xlu2 %337 }
 0x316   :  { %v339_v44 = vsub.f32 %v334_v34, %v338_v43 }
 0x318   :  { %v340_v45 = vmul.f32 1.442695, %v339_v44 }
 0x31a   :  { %1934 = vpow2.f32 %v340_v45 }
 0x31d   :  { %v519_v62 = vpop.permute.xlu2 %518 }
 0x320   :  { %v1935_v46 = vpop.eup %1934 }
 0x321   :  { %v342_v47 = vsel %vm311_vm15, %v1935_v46, 0.0 }
 0x322   :  { %343 = vadd.xlane.f32.xlu2 %v342_v47 }
 0x325   :  { %v655_v63 = vpop.permute.xlu2 %654 }
 0x329   :  { %v404_v48 = vpop.xlane.xlu0 %403 }
 0x32a   :  { %v405_v49 = vsub.f32 %v400_v38, %v404_v48 }
 0x32c   :  { %v406_v50 = vmul.f32 1.442695, %v405_v49  ;;  %v475_v51 = vpop.xlane.xlu1 %474 }
 0x32d   :  { %v476_v52 = vsub.f32 %v471_v41, %v475_v51 }
 0x32e   :  { %1936 = vpow2.f32 %v406_v50 }
 0x32f   :  { %v477_v53 = vmul.f32 1.442695, %v476_v52 }
 0x331   :  { %1938 = vpow2.f32 %v477_v53 }
 0x334   :  { %v1937_v54 = vpop.eup %1936 }
 0x335   :  { %v408_v55 = vsel %vm311_vm15, %v1937_v54, 0.0 }
 0x336   :  { %409 = vadd.xlane.f32.xlu2 %v408_v55 }
 0x337   :  { %v1939_v56 = vpop.eup %1938 }
 0x338   :  { %v479_v58 = vsel %vm311_vm15, %v1939_v56, 0.0 }
 0x33c   :  { %v348_v57 = vpop.permute.xlu0 %347 }
 0x33d   :  { %368 = vmatpush.msra.mxu2 %v348_v57 }
 0x33e   :  { %480 = vadd.xlane.f32.xlu2 %v479_v58 }
 0x344   :  { %v414_v59 = vpop.permute.xlu1 %413  ;;  %v485_v60 = vpop.permute.xlu0 %484 }
 0x345   :  { %434 = vmatpush.msrb.mxu2 %v414_v59  ;;  %505 = vmatpush.msra.mxu3 %v485_v60 }
 0x34c   :  { %v589_v61 = vpop.permute.xlu1 %588  ;;  %v517_v9 = vpop.permute.xlu0 %516 }
 0x34d   :  { %1837 = vmatpush.xpose.msk.msrb.mxu3 %vm311_vm15, %v589_v61 }
 0x354   :  { %v725_v14 = vpop.permute.xlu1 %724  ;;  %v653_v17 = vpop.permute.xlu0 %652 }
 0x356   :  { %794 = vrot.lane.b32.xlu2 %v2443_v36, %s2247_s27 }
 0x35c   :  { %v793_v18 = vpop.permute.xlu1 %792  ;;  %v723_v19 = vpop.permute.xlu0 %722 }
 0x395   :  { %v344_v2 = vpop.xlane.xlu2 %343 }
 0x396   :  { %1940 = vrcp.f32 %v344_v2 }
 0x39c   :  { %v1941_v3 = vpop.eup %1940 }
 0x39d   :  { %v346_v4 = vmul.f32 %v1941_v3, %v1935_v46 }
 0x39f   :  { %1827 = vmatmul.msk.f32.vlgmr.msra.gmra.mxu2 %vm311_vm15, %v346_v4 }
 0x3a0   :  { %1834 = vmatpush.xpose.msk.msra.mxu2 %vm311_vm15, %v519_v62 }
 0x3a9   :  { %v410_v5 = vpop.xlane.xlu2 %409 }
 0x3aa   :  { %1942 = vrcp.f32 %v410_v5 }
 0x3b0   :  { %v1943_v6 = vpop.eup %1942 }
 0x3b1   :  { %v481_v7 = vpop.xlane.xlu2 %480  ;;  %v412_v8 = vmul.f32 %v1943_v6, %v1937_v54 }
 0x3b2   :  { %1944 = vrcp.f32 %v481_v7 }
 0x3b3   :  { %1830 = vmatmul.msk.f32.vlgmr.msrb.gmra.mxu2 %vm311_vm15, %v412_v8 }
 0x3b4   :  { %1840 = vmatpush.xpose.msk.msrb.mxu2 %vm311_vm15, %v655_v63 }
 0x3b8   :  { %v1945_v11 = vpop.eup %1944 }
 0x3b9   :  { %v795_v12 = vpop.permute.xlu2 %794  ;;  %v483_v13 = vmul.f32 %v1945_v11, %v1939_v56 }
 0x3bb   :  { %1833 = vmatmul.msk.f32.vlgmr.msra.gmra.mxu3 %vm311_vm15, %v483_v13  ;;  %1835 = vmatmul.msk.f32.vlgmr.msra.gmra.mxu2 %vm311_vm15, %v517_v9 }
 0x3bc   :  { %1843 = vmatpush.xpose.msk.msra.mxu3 %vm311_vm15, %v725_v14  ;;  %1846 = vmatpush.xpose.msk.msra.mxu2 %vm311_vm15, %v795_v12 }
 0x3c3   :  { %1838 = vmatmul.msk.f32.vlgmr.msrb.gmra.mxu3 %vm311_vm15, %v2443_v36  ;;  %1841 = vmatmul.msk.f32.vlgmr.msrb.gmra.mxu2 %vm311_vm15, %v653_v17 }
 0x3cb   :  { %1844 = vmatmul.msk.f32.vlgmr.msra.gmra.mxu3 %vm311_vm15, %v723_v19  ;;  %1847 = vmatmul.msk.f32.vlgmr.msra.gmra.mxu2 %vm311_vm15, %v793_v18 }
 0x422   :  { %v370_v20 = vpop.f32.mrf.mxu2 }
 0x423   :  { %373 = vst.msk [vmem:[#allocation2] sm:$0xff] %vm311_vm15, %v370_v20 }
 0x436   :  { %v2491_v15 = vpop.f32.mrf.mxu2 }
 0x43e   :  { %v2493_v21 = vpop.f32.mrf.mxu3  ;;  %v541_v22 = vpop.f32.mrf.mxu2 }
 0x43f   :  { %v542_v23 = vadd.f32 %v541_v22, %v2439_v32 }
 0x441   :  { %v544_v24 = vsel %vm311_vm15, %v542_v23, -inf }
 0x442   :  { %545 = vmax.xlane.f32.xlu2 %v544_v24 }
 0x446   :  { %v611_v25 = vpop.f32.mrf.mxu3  ;;  %v677_v16 = vpop.f32.mrf.mxu2 }
 0x447   :  { %v612_v27 = vadd.f32 %v611_v25, %v2439_v32  ;;  %v678_v28 = vadd.f32 %v677_v16, %v2439_v32 }
 0x449   :  { %v614_v29 = vsel %vm311_vm15, %v612_v27, -inf  ;;  %v680_v30 = vsel %vm311_vm15, %v678_v28, -inf }
 0x44a   :  { %615 = vmax.xlane.f32.xlu0 %v614_v29  ;;  %681 = vmax.xlane.f32.xlu1 %v680_v30  ;;  %v307_v29 = vld [vmem:[%s2779_s5 + $0x18] sm:$0xff]  ;;  %v306_v30 = vld [vmem:[%s2779_s5 + $0x10] sm:$0xff] }
 0x44b   :  { %882 = vmatpush.msrb.mxu3 %v307_v29 }
 0x44d   :  { %883 = vmatpush.msrb.mxu3 %v306_v30 }
 0x44e   :  { %v747_v33 = vpop.f32.mrf.mxu3  ;;  %v817_v34 = vpop.f32.mrf.mxu2 }
 0x44f   :  { %v748_v35 = vadd.f32 %v747_v33, %v2439_v32  ;;  %v818_v37 = vadd.f32 %v817_v34, %v2439_v32  ;;  %v305_v33 = vld [vmem:[%s2779_s5 + $0x8] sm:$0xff]  ;;  %v304_v34 = vld [vmem:[%s2779_s5] sm:$0xff] }
 0x450   :  { %884 = vmatpush.msrb.mxu3 %v305_v33 }
 0x451   :  { %v820_v38 = vsel %vm311_vm15, %v818_v37, -inf  ;;  %v750_v39 = vsel %vm311_vm15, %v748_v35, -inf }
 0x452   :  { %821 = vmax.xlane.f32.xlu0 %v820_v38  ;;  %751 = vmax.xlane.f32.xlu2 %v750_v39 }
 0x453   :  { %885 = vmatpush.msrb.mxu3 %v304_v34 }
 0x463   :  { %555 = vrot.lane.b32.xlu1 %v2420_v26, %s2252_s29 }
 0x466   :  { %625 = vrot.lane.b32.xlu0 %v2443_v36, %s2248_s2 }
 0x4b5   :  { %v546_v40 = vpop.xlane.xlu2 %545 }
 0x4b6   :  { %v547_v41 = vsub.f32 %v542_v23, %v546_v40 }
 0x4b8   :  { %v548_v42 = vmul.f32 1.442695, %v547_v41 }
 0x4ba   :  { %1946 = vpow2.f32 %v548_v42 }
 0x4bd   :  { %v682_v43 = vpop.xlane.xlu1 %681  ;;  %v616_v44 = vpop.xlane.xlu0 %615 }
 0x4be   :  { %v683_v32 = vsub.f32 %v678_v28, %v682_v43  ;;  %v617_v45 = vsub.f32 %v612_v27, %v616_v44 }
 0x4c0   :  { %v1947_v46 = vpop.eup %1946  ;;  %v684_v47 = vmul.f32 1.442695, %v683_v32  ;;  %v618_v48 = vmul.f32 1.442695, %v617_v45 }
 0x4c1   :  { %v550_v49 = vsel %vm311_vm15, %v1947_v46, 0.0 }
 0x4c2   :  { %1948 = vpow2.f32 %v684_v47  ;;  %551 = vadd.xlane.f32.xlu1 %v550_v49 }
 0x4c3   :  { %1950 = vpow2.f32 %v618_v48 }
 0x4c5   :  { %v752_v26 = vpop.xlane.xlu2 %751  ;;  %v822_v51 = vpop.xlane.xlu0 %821 }
 0x4c6   :  { %v753_v50 = vsub.f32 %v748_v35, %v752_v26  ;;  %v823_v55 = vsub.f32 %v818_v37, %v822_v51  ;;  %v1014_v51 = vld [vmem:[#allocation12 + $0x10] sm:$0xff] }
 0x4c8   :  { %v1949_v52 = vpop.eup %1948  ;;  %v754_v53 = vmul.f32 1.442695, %v753_v50  ;;  %v824_v58 = vmul.f32 1.442695, %v823_v55  ;;  %v1015_v50 = vld [vmem:[#allocation12 + $0x18] sm:$0xff] }
 0x4c9   :  { %v1951_v54 = vpop.eup %1950  ;;  %v686_v56 = vsel %vm311_vm15, %v1949_v52, 0.0  ;;  %1034 = vmatpush.msrb.mxu2 %v1015_v50 }
 0x4ca   :  { %1952 = vpow2.f32 %v754_v53  ;;  %687 = vadd.xlane.f32.xlu0 %v686_v56  ;;  %v620_v57 = vsel %vm311_vm15, %v1951_v54, 0.0  ;;  %v168_v53 = vld [vmem:[#allocation7] sm:$0xff] }
 0x4cb   :  { %621 = vadd.xlane.f32.xlu2 %v620_v57  ;;  %1954 = vpow2.f32 %v824_v58  ;;  %1035 = vmatpush.msrb.mxu2 %v1014_v51 }
 0x4d0   :  { %v1953_v59 = vpop.eup %1952 }
 0x4d1   :  { %v756_v60 = vsel %vm311_vm15, %v1953_v59, 0.0  ;;  %v1955_v62 = vpop.eup %1954 }
 0x4d2   :  { %v826_v2 = vsel %vm311_vm15, %v1955_v62, 0.0 }
 0x4d3   :  { %757 = vadd.xlane.f32.xlu2 %v756_v60 }
 0x4d5   :  { %v556_v61 = vpop.permute.xlu1 %555 }
 0x4d6   :  { %576 = vmatpush.msra.mxu1 %v556_v61 }
 0x4d8   :  { %v626_v63 = vpop.permute.xlu0 %625 }
 0x4d9   :  { %646 = vmatpush.msra.mxu0 %v626_v63 }
 0x4db   :  { %827 = vadd.xlane.f32.xlu2 %v826_v2  ;;  %761 = vrot.lane.b32.xlu1 %v2443_v36, %s2250_s3  ;;  %v981_v2 = vld [vmem:[%s2780_s6 + $0x10] sm:$0xff] }
 0x4de   :  { %831 = vrot.lane.b32.xlu0 %v2443_v36, %s2252_s29 }
 0x4e3   :  { %440 = vrot.lane.b32.xlu1 %v2491_v15, %s2232_s22 }
 0x4e6   :  { %511 = vrot.lane.b32.xlu0 %v2493_v21, %s2253_s30 }
 0x4f3   :  { %691 = vrot.lane.b32.xlu2 %v2443_v36, %s2249_s28 }
 0x535   :  { %v552_v3 = vpop.xlane.xlu1 %551 }
 0x536   :  { %1956 = vrcp.f32 %v552_v3 }
 0x53c   :  { %v1957_v4 = vpop.eup %1956 }
 0x53d   :  { %v554_v5 = vmul.f32 %v1957_v4, %v1947_v46  ;;  %v688_v11 = vpop.xlane.xlu0 %687  ;;  %v980_v4 = vld [vmem:[%s2780_s6 + $0x8] sm:$0xff] }
 0x53e   :  { %v622_v6 = vpop.xlane.xlu2 %621 }
 0x53f   :  { %1958 = vrcp.f32 %v622_v6  ;;  %1836 = vmatmul.msk.f32.vlgmr.msra.gmra.mxu1 %vm311_vm15, %v554_v5  ;;  %v979_v6 = vld [vmem:[%s2780_s6] sm:$0xff] }
 0x545   :  { %v1959_v7 = vpop.eup %1958 }
 0x546   :  { %v624_v8 = vmul.f32 %v1959_v7, %v1951_v54  ;;  %v758_v9 = vpop.xlane.xlu2 %757 }
 0x547   :  { %1960 = vrcp.f32 %v758_v9 }
 0x548   :  { %1839 = vmatmul.msk.f32.vlgmr.msra.gmra.mxu0 %vm311_vm15, %v624_v8  ;;  %1962 = vrcp.f32 %v688_v11 }
 0x54d   :  { %v1961_v12 = vpop.eup %1960  ;;  %v762_v13 = vpop.permute.xlu1 %761 }
 0x54e   :  { %v760_v14 = vmul.f32 %v1961_v12, %v1953_v59  ;;  %v828_v36 = vpop.xlane.xlu2 %827  ;;  %782 = vmatpush.msrb.mxu0 %v762_v13  ;;  %v1963_v18 = vpop.eup %1962  ;;  %v169_v12 = vld [vmem:[#allocation7 + $0x8] sm:$0xff] }
 0x54f   :  { %1964 = vrcp.f32 %v828_v36  ;;  %v690_v20 = vmul.f32 %v1963_v18, %v1949_v52  ;;  %v1012_v52 = vld [vmem:[#allocation12] sm:$0xff] }
 0x550   :  { %1845 = vmatmul.msk.f32.vlgmr.msrb.gmra.mxu0 %vm311_vm15, %v760_v14  ;;  %v832_v17 = vpop.permute.xlu0 %831 }
 0x555   :  { %v441_v19 = vpop.permute.xlu1 %440  ;;  %v1965_v22 = vpop.eup %1964 }
 0x556   :  { %444 = vst.msk [vmem:[#allocation2] sm:$0xff] %vm443_vm1, %v441_v19  ;;  %v692_v15 = vpop.permute.xlu2 %691  ;;  %v830_v23 = vmul.f32 %v1965_v22, %v1955_v62  ;;  %v982_v62 = vld [vmem:[%s2780_s6 + $0x18] sm:$0xff]  ;;  %s2596_s6 = sld [smem:[#allocation16 + $0x81]] }
 0x557   :  { %712 = vmatpush.msrb.mxu1 %v692_v15  ;;  %1001 = vmatpush.msra.mxu0 %v982_v62 }
 0x558   :  { %1842 = vmatmul.msk.f32.vlgmr.msrb.gmra.mxu1 %vm311_vm15, %v690_v20  ;;  %v512_v21 = vpop.permute.xlu0 %511 }
 0x559   :  { %852 = vmatpush.msra.mxu1 %v832_v17  ;;  %515 = vst.msk [vmem:[#allocation2] sm:$0xff] %vm514_vm2, %v512_v21  ;;  %1002 = vmatpush.msra.mxu0 %v981_v2 }
 0x55b   :  { %1003 = vmatpush.msra.mxu0 %v980_v4 }
 0x55c   :  { %v976_v33 = vstv %s2596_s6  ;;  %s1805_s6 = sshll.u32 %s2788_s14, 4  ;;  %s1806_s6 = int_to_ptr.hbm [resolvable:$true] %s1805_s6 }
 0x55d   :  { %1004 = vmatpush.msra.mxu0 %v979_v6 }
 0x560   :  { %1848 = vmatmul.msk.f32.vlgmr.msra.gmra.mxu1 %vm311_vm15, %v830_v23 }
 0x5bc   :  { %v578_v24 = vpop.f32.mrf.mxu1 }
 0x5bd   :  { %582 = vrot.lane.b32.xlu1 %v578_v24, %s2254_s15  ;;  %v917_v24 = vstv %s2593_s13 }
 0x5c5   :  { %v648_v25 = vpop.f32.mrf.mxu0 }
 0x5c6   :  { %651 = vst.msk [vmem:[#allocation2 + $0x8] sm:$0xff] %vm311_vm15, %v648_v25 }
 0x5cd   :  { %v784_v16 = vpop.f32.mrf.mxu0 }
 0x5ce   :  { %788 = vrot.lane.b32.xlu2 %v784_v16, %s2253_s30 }
 0x5d5   :  { %v714_v27 = vpop.f32.mrf.mxu1 }
 0x5d6   :  { %718 = vrot.lane.b32.xlu0 %v714_v27, %s2232_s22 }
 0x5dd   :  { %v854_v28 = vpop.f32.mrf.mxu1 }
 0x5de   :  { %858 = vrot.lane.b32.xlu1 %v854_v28, %s2254_s15 }
 0x628   :  { %v789_v39 = vpop.permute.xlu2 %788 }
 0x62f   :  { %v583_v35 = vpop.permute.xlu1 %582 }
 0x630   :  { %586 = vst.msk [vmem:[#allocation2] sm:$0xff] %vm585_vm3, %v583_v35 }
 0x637   :  { %v862_v37 = vld [vmem:[#allocation2] sm:$0xff] }
 0x638   :  { %1849 = vmatmul.msk.f32.vlgmr.msrb.gmra.mxu3 %vm174_vm0, %v862_v37 }
 0x648   :  { %v719_v38 = vpop.permute.xlu0 %718 }
 0x649   :  { %721 = vst.msk [vmem:[#allocation2 + $0x8] sm:$0xff] %vm443_vm1, %v719_v38 }
 0x64a   :  { %791 = vst.msk [vmem:[#allocation2 + $0x8] sm:$0xff] %vm514_vm2, %v789_v39 }
 0x650   :  { %v859_v40 = vpop.permute.xlu1 %858 }
 0x651   :  { %861 = vst.msk [vmem:[#allocation2 + $0x8] sm:$0xff] %vm585_vm3, %v859_v40 }
 0x658   :  { %v863_v41 = vld [vmem:[#allocation2 + $0x8] sm:$0xff] }
 0x659   :  { %1850 = vmatmul.msk.f32.gmra.mxu3 %vm174_vm0, %v863_v41 }
 0x6bb   :  { %v887_v42 = vpop.f32.mrf.mxu3 }
 0x6bc   :  { %v2555_v43 = vadd.f32 %v887_v42, %v2370_v0 }
 0x6be   :  { %v897_v44 = vsel %vm174_vm0, %v2555_v43, 0.0 }
 0x6bf   :  { %898 = vadd.xlane.f32.xlu0 %v897_v44 }
 0x6dc   :  { %v890_v32 = vpop.f32.mrf.mxu3 }
 0x6dd   :  { %v2560_v45 = vadd.f32 %v890_v32, %v2372_v1  ;;  %v1013_v1 = vld [vmem:[#allocation12 + $0x8] sm:$0xff] }
 0x6de   :  { %1036 = vmatpush.msrb.mxu2 %v1013_v1 }
 0x6df   :  { %v900_v46 = vsel %vm174_vm0, %v2560_v45, 0.0 }
 0x6e0   :  { %901 = vadd.xlane.f32.xlu2 %v900_v46  ;;  %1037 = vmatpush.msrb.mxu2 %v1012_v52 }
 0x6e1   :  { %1855 = vmatmul.msk.f32.vlgmr.msrb.gmra.mxu2 %vm174_vm0, %v168_v53 }
 0x6e9   :  { %1856 = vmatmul.msk.f32.gmra.mxu2 %vm174_vm0, %v169_v12 }
 0x732   :  { %v899_v47 = vpop.xlane.xlu0 %898 }
 0x733   :  { %v903_v48 = vmul.f32 %v899_v47, %v2378_v10 }
 0x735   :  { %v2566_v49 = vsub.f32 %v2555_v43, %v903_v48 }
 0x737   :  { %v907_v0 = vmul.f32 %v2566_v49, %v2566_v49  ;;  %v918_v27 = vmul.f32 %v917_v24, %v2566_v49 }
 0x739   :  { %v909_v26 = vsel %vm174_vm0, %v907_v0, 0.0 }
 0x73a   :  { %910 = vadd.xlane.f32.xlu1 %v909_v26 }
 0x753   :  { %v902_v54 = vpop.xlane.xlu2 %901 }
 0x754   :  { %v904_v55 = vmul.f32 %v902_v54, %v2378_v10 }
 0x756   :  { %v2574_v56 = vsub.f32 %v2560_v45, %v904_v55 }
 0x758   :  { %v908_v57 = vmul.f32 %v2574_v56, %v2574_v56  ;;  %v919_v54 = vmul.f32 %v917_v24, %v2574_v56 }
 0x75a   :  { %v912_v58 = vsel %vm174_vm0, %v908_v57, 0.0 }
 0x75b   :  { %913 = vadd.xlane.f32.xlu0 %v912_v58 }
 0x764   :  { %v2602_v40 = vpop.f32.mrf.mxu2 }
 0x765   :  { %1857 = vmatpush.xpose.msk.msrb.mxu1 %vm311_vm15, %v2602_v40  ;;  %1115 = vrot.lane.b32.xlu2 %v2602_v40, %s2243_s24 }
 0x76d   :  { %1255 = vrot.lane.b32.xlu2 %v2602_v40, %s2251_s7 }
 0x76f   :  { %1185 = vrot.lane.b32.xlu0 %v2602_v40, %s2246_s1 }
 0x7ad   :  { %v911_v59 = vpop.xlane.xlu1 %910 }
 0x7ae   :  { %v915_v60 = vmul.f32 %v911_v59, %v2406_v31 }
 0x7b0   :  { %1966 = vrsqrt.f32 %v915_v60  ;;  %vm927_vm4 = vcmp.eq.f32.partialorder %v915_v60, inf  ;;  %v930_v11 = vand.u32 2147483648, %v915_v60  ;;  %vm929_vm5 = vcmp.eq.f32.partialorder %v915_v60, 0.0 }
 0x7b6   :  { %v1967_v61 = vpop.eup %1966 }
 0x7b7   :  { %v921_v63 = vmul.f32 %v1967_v61, %v915_v60 }
 0x7b9   :  { %v922_v3 = vmul.f32 %v1967_v61, %v921_v63 }
 0x7bb   :  { %v923_v5 = vmul.f32 0.5, %v922_v3 }
 0x7bd   :  { %v924_v7 = vsub.f32 1.5, %v923_v5 }
 0x7bf   :  { %v925_v8 = vmul.f32 %v1967_v61, %v924_v7  ;;  %v1116_v62 = vpop.permute.xlu2 %1115 }
 0x7c0   :  { %1860 = vmatpush.xpose.msk.msra.mxu3 %vm311_vm15, %v1116_v62 }
 0x7c1   :  { %v926_v9 = vmul.f32 %v925_v8, %v915_v60 }
 0x7c3   :  { %v928_v13 = vsel %vm927_vm4, %v915_v60, %v926_v9  ;;  %v2614_v60 = vpop.f32.mrf.mxu2  ;;  %v171_v9 = vld [vmem:[#allocation10] sm:$0xff] }
 0x7c4   :  { %v931_v14 = vsel %vm929_vm5, %v930_v11, %v928_v13  ;;  %1389 = vrot.lane.b32.xlu2 %v2614_v60, %s2243_s24  ;;  %v1915_v3 = vpack.i.bf16 %v2614_v60, %v2602_v40 }
 0x7c5   :  { %v944_v36 = vadd.f32 1e-06, %v931_v14 }
 0x7c7   :  { %1968 = vrcp.f32 %v944_v36  ;;  %v957_v21 = vand.u32 2147483648, %v944_v36  ;;  %v955_v23 = vand.u32 2147483647, %v944_v36  ;;  %vm951_vm7 = vweird.f32 %v944_v36  ;;  %v1256_v63 = vpop.permute.xlu2 %1255 }
 0x7c8   :  { %1866 = vmatpush.xpose.msk.msrb.mxu3 %vm311_vm15, %v1256_v63 }
 0x7c9   :  { %v958_v16 = vor.u32 1.1754944e-38, %v957_v21  ;;  %vm956_vm9 = vcmp.eq.f32.partialorder %v955_v23, 8.507059e+37 }
 0x7cc   :  { %1529 = vrot.lane.b32.xlu2 %v2614_v60, %s2251_s7 }
 0x7cd   :  { %v1969_v17 = vpop.eup %1968 }
 0x7ce   :  { %v914_v18 = vpop.xlane.xlu0 %913  ;;  %v947_v19 = vmul.f32 %v1969_v17, %v944_v36  ;;  %vm952_vm6 = vweird.f32 %v1969_v17 }
 0x7cf   :  { %v916_v20 = vmul.f32 %v914_v18, %v2406_v31  ;;  %vm953_vm8 = vmor %vm951_vm7, %vm952_vm6 }
 0x7d0   :  { %v948_v15 = vsub.f32 1.0, %v947_v19 }
 0x7d1   :  { %1970 = vrsqrt.f32 %v916_v20  ;;  %vm939_vm10 = vcmp.eq.f32.partialorder %v916_v20, inf  ;;  %v942_v32 = vand.u32 2147483648, %v916_v20  ;;  %vm941_vm11 = vcmp.eq.f32.partialorder %v916_v20, 0.0 }
 0x7d2   :  { %v949_v22 = vmul.f32 %v1969_v17, %v948_v15 }
 0x7d4   :  { %v950_v25 = vadd.f32 %v1969_v17, %v949_v22 }
 0x7d6   :  { %v954_v28 = vsel %vm953_vm8, %v1969_v17, %v950_v25 }
 0x7d7   :  { %v1971_v29 = vpop.eup %1970  ;;  %v959_v30 = vsel %vm956_vm9, %v958_v16, %v954_v28 }
 0x7d8   :  { %v933_v34 = vmul.f32 %v1971_v29, %v916_v20  ;;  %v960_v35 = vmul.f32 %v959_v30, %v918_v27 }
 0x7da   :  { %v934_v37 = vmul.f32 %v1971_v29, %v933_v34  ;;  %v977_v38 = vadd.f32 %v976_v33, %v960_v35 }
 0x7dc   :  { %v935_v39 = vmul.f32 0.5, %v934_v37  ;;  %1853 = vmatmul.msk.f32.vlgmr.msra.gmra.mxu0 %vm174_vm0, %v977_v38 }
 0x7de   :  { %v936_v41 = vsub.f32 1.5, %v935_v39 }
 0x7e0   :  { %v937_v42 = vmul.f32 %v1971_v29, %v936_v41 }
 0x7e1   :  { %v1186_v56 = vpop.permute.xlu0 %1185 }
 0x7e2   :  { %v938_v44 = vmul.f32 %v937_v42, %v916_v20  ;;  %1863 = vmatpush.xpose.msk.msra.mxu2 %vm311_vm15, %v1186_v56 }
 0x7e4   :  { %v940_v46 = vsel %vm939_vm10, %v916_v20, %v938_v44 }
 0x7e5   :  { %v943_v47 = vsel %vm941_vm11, %v942_v32, %v940_v46 }
 0x7e6   :  { %v945_v48 = vadd.f32 1e-06, %v943_v47  ;;  %1869 = vmatpush.xpose.msk.msrb.mxu2 %vm311_vm15, %v2614_v60 }
 0x7e8   :  { %1972 = vrcp.f32 %v945_v48  ;;  %v972_v50 = vand.u32 2147483648, %v945_v48  ;;  %v970_v1 = vand.u32 2147483647, %v945_v48  ;;  %vm966_vm13 = vweird.f32 %v945_v48 }
 0x7ea   :  { %v973_v53 = vor.u32 1.1754944e-38, %v972_v50  ;;  %vm971_vm4 = vcmp.eq.f32.partialorder %v970_v1, 8.507059e+37 }
 0x7ee   :  { %v1973_v49 = vpop.eup %1972 }
 0x7ef   :  { %v962_v0 = vmul.f32 %v1973_v49, %v945_v48  ;;  %vm967_vm12 = vweird.f32 %v1973_v49 }
 0x7f0   :  { %vm968_vm14 = vmor %vm966_vm13, %vm967_vm12  ;;  %vm1765_vm13 = vcmask 523264  }
 0x7f1   :  { %v963_v26 = vsub.f32 1.0, %v962_v0 }
 0x7f3   :  { %v964_v51 = vmul.f32 %v1973_v49, %v963_v26 }
 0x7f5   :  { %v965_v52 = vadd.f32 %v1973_v49, %v964_v51 }
 0x7f7   :  { %v969_v55 = vsel %vm968_vm14, %v1973_v49, %v965_v52 }
 0x7f8   :  { %v974_v57 = vsel %vm971_vm4, %v973_v53, %v969_v55 }
 0x7f9   :  { %v975_v58 = vmul.f32 %v974_v57, %v919_v54 }
 0x7fb   :  { %v978_v59 = vadd.f32 %v976_v33, %v975_v58 }
 0x7fd   :  { %1854 = vmatmul.msk.f32.gmra.mxu0 %vm174_vm0, %v978_v59 }
 0x81e   :  { %v1390_v4 = vpop.permute.xlu2 %1389 }
 0x826   :  { %v1530_v7 = vpop.permute.xlu2 %1529 }
 0x859   :  { %v1006_v61 = vpop.f32.mrf.mxu0 }
 0x85a   :  { %1183 = vrot.lane.b32.xlu0 %v1006_v61, %s2246_s1  ;;  %1113 = vrot.lane.b32.xlu1 %v1006_v61, %s2243_s24 }
 0x85b   :  { %1858 = vmatmul.msk.f32.vlgmr.msrb.gmra.mxu1 %vm311_vm15, %v1006_v61 }
 0x862   :  { %1253 = vrot.lane.b32.xlu1 %v1006_v61, %s2251_s7 }
 0x86a   :  { %1459 = vrot.lane.b32.xlu1 %v2614_v60, %s2246_s1 }
 0x87a   :  { %v1009_v2 = vpop.f32.mrf.mxu0 }
 0x87b   :  { %1527 = vrot.lane.b32.xlu1 %v1009_v2, %s2251_s7  ;;  %1387 = vrot.lane.b32.xlu0 %v1009_v2, %s2243_s24  ;;  %s2726_s24 = sld [smem:[#allocation16 + $0x101]] }
 0x883   :  { %1916 = vrot.lane.b32.xlu1 %v1915_v3, %s2244_s25  ;;  %1457 = vrot.lane.b32.xlu0 %v1009_v2, %s2246_s1 }
 0x8cc   :  { %v1114_v5 = vpop.permute.xlu1 %1113  ;;  %v1184_v6 = vpop.permute.xlu0 %1183 }
 0x8cd   :  { %1861 = vmatmul.msk.f32.vlgmr.msra.gmra.mxu3 %vm311_vm15, %v1114_v5  ;;  %1864 = vmatmul.msk.f32.vlgmr.msra.gmra.mxu2 %vm311_vm15, %v1184_v6 }
 0x8ce   :  { %1872 = vmatpush.xpose.msk.msra.mxu3 %vm311_vm15, %v1390_v4 }
 0x8d4   :  { %v1254_v8 = vpop.permute.xlu1 %1253 }
 0x8d5   :  { %1867 = vmatmul.msk.f32.vlgmr.msrb.gmra.mxu3 %vm311_vm15, %v1254_v8  ;;  %1870 = vmatmul.msk.f32.vlgmr.msrb.gmra.mxu2 %vm311_vm15, %v1009_v2 }
 0x8d6   :  { %1878 = vmatpush.xpose.msk.msrb.mxu3 %vm311_vm15, %v1530_v7 }
 0x8d8   :  { %v1072_v11 = vpop.f32.mrf.mxu1 }
 0x8d9   :  { %v1073_v12 = vadd.f32 %v1072_v11, %v171_v9 }
 0x8db   :  { %v1075_v13 = vsel %vm311_vm15, %v1073_v12, -inf }
 0x8dc   :  { %1076 = vmax.xlane.f32.xlu2 %v1075_v13  ;;  %v1460_v14 = vpop.permute.xlu1 %1459 }
 0x8dd   :  { %1875 = vmatpush.xpose.msk.msra.mxu2 %vm311_vm15, %v1460_v14 }
 0x8ed   :  { %v1528_v36 = vpop.permute.xlu1 %1527  ;;  %v1388_v17 = vpop.permute.xlu0 %1387 }
 0x8ee   :  { %1873 = vmatmul.msk.f32.vlgmr.msra.gmra.mxu3 %vm311_vm15, %v1388_v17 }
 0x8f4   :  { %1222 = vrot.lane.b32.xlu2 %v2602_v40, %s2242_s23 }
 0x8f5   :  { %v2648_v18 = vpop.permute.xlu1 %1916  ;;  %v1458_v19 = vpop.permute.xlu0 %1457 }
 0x8f6   :  { %v1918_v20 = vunpack.i.l.bf16 %v2648_v18  ;;  %1876 = vmatmul.msk.f32.vlgmr.msra.gmra.mxu2 %vm311_vm15, %v1458_v19  ;;  %1879 = vmatmul.msk.f32.vlgmr.msrb.gmra.mxu3 %vm311_vm15, %v1528_v36  ;;  %v1919_v3 = vunpack.i.h.bf16 %v2648_v18 }
 0x8f8   :  { %1107 = vmatpush.msra.mxu1 %v1918_v20 }
 0x94f   :  { %v1077_v15 = vpop.xlane.xlu2 %1076 }
 0x950   :  { %v1078_v21 = vsub.f32 %v1073_v12, %v1077_v15  ;;  %v1138_v22 = vpop.f32.mrf.mxu3  ;;  %v1208_v23 = vpop.f32.mrf.mxu2 }
 0x951   :  { %v1139_v24 = vadd.f32 %v1138_v22, %v171_v9  ;;  %v1209_v25 = vadd.f32 %v1208_v23, %v171_v9 }
 0x952   :  { %v1079_v16 = vmul.f32 1.442695, %v1078_v21 }
 0x953   :  { %v1141_v27 = vsel %vm311_vm15, %v1139_v24, -inf  ;;  %v1211_v28 = vsel %vm311_vm15, %v1209_v25, -inf }
 0x954   :  { %1974 = vpow2.f32 %v1079_v16  ;;  %1142 = vmax.xlane.f32.xlu0 %v1141_v27  ;;  %1212 = vmax.xlane.f32.xlu1 %v1211_v28 }
 0x957   :  { %v1223_v29 = vpop.permute.xlu2 %1222 }
 0x958   :  { %1243 = vmatpush.msrb.mxu1 %v1223_v29  ;;  %v1278_v30 = vpop.f32.mrf.mxu3  ;;  %v1346_v38 = vpop.f32.mrf.mxu2 }
 0x959   :  { %v1279_v33 = vadd.f32 %v1278_v30, %v171_v9  ;;  %v1347_v47 = vadd.f32 %v1346_v38, %v171_v9 }
 0x95a   :  { %v1975_v34 = vpop.eup %1974 }
 0x95b   :  { %v1281_v35 = vsel %vm311_vm15, %v1279_v33, -inf  ;;  %v1081_v37 = vsel %vm311_vm15, %v1975_v34, 0.0  ;;  %v1349_v48 = vsel %vm311_vm15, %v1347_v47, -inf }
 0x95c   :  { %1282 = vmax.xlane.f32.xlu2 %v1281_v35  ;;  %1082 = vadd.xlane.f32.xlu1 %v1081_v37 }
 0x968   :  { %1152 = vrot.lane.b32.xlu0 %v2602_v40, %s2245_s26 }
 0x971   :  { %v1412_v39 = vpop.f32.mrf.mxu3 }
 0x972   :  { %v1413_v41 = vadd.f32 %v1412_v39, %v171_v9 }
 0x974   :  { %v1415_v42 = vsel %vm311_vm15, %v1413_v41, -inf }
 0x975   :  { %1416 = vmax.xlane.f32.xlu1 %v1415_v42 }
 0x979   :  { %v1482_v44 = vpop.f32.mrf.mxu2  ;;  %v1552_v49 = vpop.f32.mrf.mxu3 }
 0x97a   :  { %v1483_v32 = vadd.f32 %v1482_v44, %v171_v9  ;;  %v1553_v0 = vadd.f32 %v1552_v49, %v171_v9 }
 0x97c   :  { %v1485_v46 = vsel %vm311_vm15, %v1483_v32, -inf  ;;  %v1555_v26 = vsel %vm311_vm15, %v1553_v0, -inf }
 0x97d   :  { %1486 = vmax.xlane.f32.xlu2 %v1485_v46 }
 0x98e   :  { %1292 = vrot.lane.b32.xlu1 %v2602_v40, %s2247_s27 }
 0x992   :  { %1350 = vmax.xlane.f32.xlu0 %v1349_v48 }
 0x99a   :  { %1556 = vmax.xlane.f32.xlu0 %v1555_v26 }
 0x9c7   :  { %v1213_v50 = vpop.xlane.xlu1 %1212  ;;  %v1143_v51 = vpop.xlane.xlu0 %1142 }
 0x9c8   :  { %v1214_v1 = vsub.f32 %v1209_v25, %v1213_v50  ;;  %v1144_v52 = vsub.f32 %v1139_v24, %v1143_v51 }
 0x9ca   :  { %v1215_v53 = vmul.f32 1.442695, %v1214_v1  ;;  %v1145_v54 = vmul.f32 1.442695, %v1144_v52 }
 0x9cc   :  { %1976 = vpow2.f32 %v1215_v53 }
 0x9cd   :  { %1978 = vpow2.f32 %v1145_v54 }
 0x9cf   :  { %v1283_v55 = vpop.xlane.xlu2 %1282  ;;  %v1083_v57 = vpop.xlane.xlu1 %1082 }
 0x9d0   :  { %v1284_v58 = vsub.f32 %v1279_v33, %v1283_v55  ;;  %1980 = vrcp.f32 %v1083_v57 }
 0x9d2   :  { %v1977_v40 = vpop.eup %1976  ;;  %v1285_v59 = vmul.f32 1.442695, %v1284_v58 }
 0x9d3   :  { %v1979_v61 = vpop.eup %1978  ;;  %v1217_v56 = vsel %vm311_vm15, %v1977_v40, 0.0 }
 0x9d4   :  { %1982 = vpow2.f32 %v1285_v59  ;;  %1218 = vadd.xlane.f32.xlu0 %v1217_v56  ;;  %v1147_v62 = vsel %vm311_vm15, %v1979_v61, 0.0 }
 0x9d5   :  { %1148 = vadd.xlane.f32.xlu2 %v1147_v62  ;;  %v1048_v62 = vld [vmem:[#allocation13 + $0x18] sm:$0xff] }
 0x9d6   :  { %v1981_v63 = vpop.eup %1980  ;;  %1617 = vmatpush.msrb.mxu2 %v1048_v62 }
 0x9d7   :  { %v1085_v2 = vmul.f32 %v1981_v63, %v1975_v34  ;;  %v1047_v63 = vld [vmem:[#allocation13 + $0x10] sm:$0xff] }
 0x9d8   :  { %1618 = vmatpush.msrb.mxu2 %v1047_v63 }
 0x9d9   :  { %1859 = vmatmul.msk.f32.vlgmr.msra.gmra.mxu1 %vm311_vm15, %v1085_v2  ;;  %v1046_v2 = vld [vmem:[#allocation13 + $0x8] sm:$0xff] }
 0x9da   :  { %v1983_v4 = vpop.eup %1982  ;;  %1381 = vmatpush.msra.mxu1 %v1919_v3  ;;  %v1153_v5 = vpop.permute.xlu0 %1152  ;;  %v1045_v3 = vld [vmem:[#allocation13] sm:$0xff]  ;;  %1619 = vmatpush.msrb.mxu2 %v1046_v2 }
 0x9db   :  { %1173 = vmatpush.msrb.mxu0 %v1153_v5  ;;  %v1287_v6 = vsel %vm311_vm15, %v1983_v4, 0.0 }
 0x9dc   :  { %1620 = vmatpush.msrb.mxu2 %v1045_v3  ;;  %v1760_v3 = vld [vmem:[%s2785_s11 + $0x38] sm:$0xff] }
 0x9dd   :  { %1288 = vadd.xlane.f32.xlu2 %v1287_v6  ;;  %1780 = vmatpush.msra.mxu3 %v1760_v3 }
 0x9e8   :  { %v1417_v7 = vpop.xlane.xlu1 %1416 }
 0x9e9   :  { %v1418_v8 = vsub.f32 %v1413_v41, %v1417_v7 }
 0x9eb   :  { %v1419_v9 = vmul.f32 1.442695, %v1418_v8 }
 0x9ed   :  { %1984 = vpow2.f32 %v1419_v9 }
 0x9f0   :  { %v1487_v11 = vpop.xlane.xlu2 %1486 }
 0x9f1   :  { %v1488_v12 = vsub.f32 %v1483_v32, %v1487_v11 }
 0x9f3   :  { %v1985_v13 = vpop.eup %1984  ;;  %v1489_v14 = vmul.f32 1.442695, %v1488_v12 }
 0x9f4   :  { %v1421_v36 = vsel %vm311_vm15, %v1985_v13, 0.0 }
 0x9f5   :  { %1986 = vpow2.f32 %v1489_v14  ;;  %1422 = vadd.xlane.f32.xlu0 %v1421_v36 }
 0x9fb   :  { %v1987_v17 = vpop.eup %1986 }
 0x9fc   :  { %v1491_v18 = vsel %vm311_vm15, %v1987_v17, 0.0 }
 0x9fd   :  { %1492 = vadd.xlane.f32.xlu1 %v1491_v18 }
 0xa00   :  { %v1293_v19 = vpop.permute.xlu1 %1292 }
 0xa01   :  { %1313 = vmatpush.msra.mxu0 %v1293_v19 }
 0xa05   :  { %v1351_v20 = vpop.xlane.xlu0 %1350 }
 0xa06   :  { %v1352_v15 = vsub.f32 %v1347_v47, %v1351_v20 }
 0xa08   :  { %v1353_v21 = vmul.f32 1.442695, %v1352_v15 }
 0xa09   :  { %1426 = vrot.lane.b32.xlu0 %v2614_v60, %s2245_s26 }
 0xa0a   :  { %1988 = vpow2.f32 %v1353_v21 }
 0xa0d   :  { %v1557_v22 = vpop.xlane.xlu0 %1556 }
 0xa0e   :  { %v1558_v23 = vsub.f32 %v1553_v0, %v1557_v22 }
 0xa10   :  { %v1989_v24 = vpop.eup %1988  ;;  %v1559_v25 = vmul.f32 1.442695, %v1558_v23 }
 0xa11   :  { %v1355_v16 = vsel %vm311_vm15, %v1989_v24, 0.0 }
 0xa12   :  { %1990 = vpow2.f32 %v1559_v25  ;;  %1356 = vadd.xlane.f32.xlu2 %v1355_v16 }
 0xa16   :  { %1496 = vrot.lane.b32.xlu1 %v2614_v60, %s2242_s23  ;;  %s2724_s23 = sld [smem:[#allocation16 + $0x100]] }
 0xa18   :  { %v1991_v27 = vpop.eup %1990 }
 0xa19   :  { %v1561_v28 = vsel %vm311_vm15, %v1991_v27, 0.0 }
 0xa1a   :  { %1562 = vadd.xlane.f32.xlu2 %v1561_v28  ;;  %v1716_v28 = vld [vmem:[#allocation15 + $0x10] sm:$0xff] }
 0xa32   :  { %1566 = vrot.lane.b32.xlu2 %v2614_v60, %s2247_s27 }
 0xa47   :  { %v1219_v29 = vpop.xlane.xlu0 %1218 }
 0xa48   :  { %v1149_v30 = vpop.xlane.xlu2 %1148  ;;  %1992 = vrcp.f32 %v1219_v29  ;;  %v1715_v29 = vld [vmem:[#allocation15 + $0x8] sm:$0xff] }
 0xa49   :  { %1994 = vrcp.f32 %v1149_v30  ;;  %v1714_v30 = vld [vmem:[#allocation15] sm:$0xff] }
 0xa4e   :  { %v1993_v33 = vpop.eup %1992 }
 0xa4f   :  { %v1995_v34 = vpop.eup %1994  ;;  %v1221_v35 = vmul.f32 %v1993_v33, %v1977_v40 }
 0xa50   :  { %v1151_v37 = vmul.f32 %v1995_v34, %v1979_v61  ;;  %v1289_v38 = vpop.xlane.xlu2 %1288 }
 0xa51   :  { %1996 = vrcp.f32 %v1289_v38  ;;  %1865 = vmatmul.msk.f32.vlgmr.msrb.gmra.mxu1 %vm311_vm15, %v1221_v35 }
 0xa52   :  { %1862 = vmatmul.msk.f32.vlgmr.msrb.gmra.mxu0 %vm311_vm15, %v1151_v37 }
 0xa56   :  { %v1109_v39 = vpop.f32.mrf.mxu1 }
 0xa57   :  { %v1997_v41 = vpop.eup %1996  ;;  %1112 = vst.msk [vmem:[#allocation2] sm:$0xff] %vm311_vm15, %v1109_v39 }
 0xa58   :  { %v1291_v42 = vmul.f32 %v1997_v41, %v1983_v4 }
 0xa5a   :  { %1868 = vmatmul.msk.f32.vlgmr.msra.gmra.mxu0 %vm311_vm15, %v1291_v42 }
 0xa68   :  { %v1423_v60 = vpop.xlane.xlu0 %1422 }
 0xa69   :  { %1998 = vrcp.f32 %v1423_v60 }
 0xa6f   :  { %v1999_v44 = vpop.eup %1998 }
 0xa70   :  { %v1425_v32 = vmul.f32 %v1999_v44, %v1985_v13  ;;  %v1493_v47 = vpop.xlane.xlu1 %1492 }
 0xa7b   :  { %v1427_v46 = vpop.permute.xlu0 %1426 }
 0xa7c   :  { %1447 = vmatpush.msrb.mxu0 %v1427_v46 }
 0xa7d   :  { %1874 = vmatmul.msk.f32.vlgmr.msrb.gmra.mxu0 %vm311_vm15, %v1425_v32 }
 0xa85   :  { %v1357_v48 = vpop.xlane.xlu2 %1356 }
 0xa86   :  { %2000 = vrcp.f32 %v1357_v48 }
 0xa87   :  { %2002 = vrcp.f32 %v1493_v47 }
 0xa88   :  { %v1497_v49 = vpop.permute.xlu1 %1496 }
 0xa89   :  { %1517 = vmatpush.msrb.mxu1 %v1497_v49 }
 0xa8c   :  { %v2001_v0 = vpop.eup %2000 }
 0xa8d   :  { %v1359_v26 = vmul.f32 %v2001_v0, %v1989_v24  ;;  %v1563_v50 = vpop.xlane.xlu2 %1562  ;;  %v2003_v51 = vpop.eup %2002 }
 0xa8e   :  { %2004 = vrcp.f32 %v1563_v50  ;;  %v1495_v52 = vmul.f32 %v2003_v51, %v1987_v17  ;;  %v1652_v51 = vstv %s2724_s23 }
 0xa8f   :  { %1871 = vmatmul.msk.f32.vlgmr.msra.gmra.mxu1 %vm311_vm15, %v1359_v26 }
 0xa94   :  { %v2005_v1 = vpop.eup %2004 }
 0xa95   :  { %v1565_v53 = vmul.f32 %v2005_v1, %v1991_v27  ;;  %v1567_v54 = vpop.permute.xlu2 %1566  ;;  %v1717_v27 = vld [vmem:[#allocation15 + $0x18] sm:$0xff] }
 0xa96   :  { %1587 = vmatpush.msra.mxu0 %v1567_v54  ;;  %1740 = vmatpush.msra.mxu1 %v1717_v27 }
 0xa97   :  { %1877 = vmatmul.msk.f32.vlgmr.msrb.gmra.mxu1 %vm311_vm15, %v1495_v52  ;;  %1880 = vmatmul.msk.f32.vlgmr.msra.gmra.mxu0 %vm311_vm15, %v1565_v53 }
 0xa98   :  { %1741 = vmatpush.msra.mxu1 %v1716_v28 }
 0xa9a   :  { %1742 = vmatpush.msra.mxu1 %v1715_v29  ;;  %v1755_v29 = vld [vmem:[%s2785_s11 + $0x10] sm:$0xff] }
 0xa9c   :  { %1743 = vmatpush.msra.mxu1 %v1714_v30  ;;  %v1754_v30 = vld [vmem:[%s2785_s11 + $0x8] sm:$0xff] }
 0xace   :  { %v1245_v57 = vpop.f32.mrf.mxu1 }
 0xacf   :  { %v1175_v55 = vpop.f32.mrf.mxu0 }
 0xad0   :  { %1179 = vrot.lane.b32.xlu0 %v1175_v55, %s2232_s22 }
 0xad7   :  { %v1315_v58 = vpop.f32.mrf.mxu0 }
 0xad8   :  { %1319 = vrot.lane.b32.xlu1 %v1315_v58, %s2254_s15  ;;  %1249 = vrot.lane.b32.xlu0 %v1245_v57, %s2253_s30  ;;  %v1711_v57 = vstv %s2726_s24 }
 0xafa   :  { %v1449_v40 = vpop.f32.mrf.mxu0 }
 0xafb   :  { %1453 = vrot.lane.b32.xlu0 %v1449_v40, %s2232_s22 }
 0xb0c   :  { %v1383_v59 = vpop.f32.mrf.mxu1 }
 0xb0d   :  { %1386 = vst.msk [vmem:[#allocation2 + $0x8] sm:$0xff] %vm311_vm15, %v1383_v59 }
 0xb14   :  { %v1519_v61 = vpop.f32.mrf.mxu1  ;;  %v1589_v56 = vpop.f32.mrf.mxu0 }
 0xb15   :  { %1523 = vrot.lane.b32.xlu2 %v1519_v61, %s2253_s30  ;;  %1593 = vrot.lane.b32.xlu1 %v1589_v56, %s2254_s15 }
 0xb42   :  { %v1180_v4 = vpop.permute.xlu0 %1179 }
 0xb43   :  { %1182 = vst.msk [vmem:[#allocation2] sm:$0xff] %vm443_vm1, %v1180_v4  ;;  %v1759_v4 = vld [vmem:[%s2785_s11 + $0x30] sm:$0xff] }
 0xb44   :  { %1781 = vmatpush.msra.mxu3 %v1759_v4 }
 0xb4a   :  { %v1320_v5 = vpop.permute.xlu1 %1319  ;;  %v1250_v6 = vpop.permute.xlu0 %1249 }
 0xb4b   :  { %1252 = vst.msk [vmem:[#allocation2] sm:$0xff] %vm514_vm2, %v1250_v6  ;;  %v1758_v6 = vld [vmem:[%s2785_s11 + $0x28] sm:$0xff] }
 0xb4c   :  { %1322 = vst.msk [vmem:[#allocation2] sm:$0xff] %vm585_vm3, %v1320_v5  ;;  %1782 = vmatpush.msra.mxu3 %v1758_v6 }
 0xb53   :  { %v1597_v7 = vld [vmem:[#allocation2] sm:$0xff] }
 0xb54   :  { %1881 = vmatmul.msk.f32.vlgmr.msrb.gmra.mxu2 %vm174_vm0, %v1597_v7  ;;  %v1757_v7 = vld [vmem:[%s2785_s11 + $0x20] sm:$0xff] }
 0xb55   :  { %1783 = vmatpush.msra.mxu3 %v1757_v7 }
 0xb6d   :  { %v1454_v8 = vpop.permute.xlu0 %1453 }
 0xb6e   :  { %1456 = vst.msk [vmem:[#allocation2 + $0x8] sm:$0xff] %vm443_vm1, %v1454_v8 }
 0xb6f   :  { %v1524_v9 = vpop.permute.xlu2 %1523 }
 0xb70   :  { %1526 = vst.msk [vmem:[#allocation2 + $0x8] sm:$0xff] %vm514_vm2, %v1524_v9 }
 0xb87   :  { %v1594_v11 = vpop.permute.xlu1 %1593 }
 0xb88   :  { %1596 = vst.msk [vmem:[#allocation2 + $0x8] sm:$0xff] %vm585_vm3, %v1594_v11  ;;  %v1756_v11 = vld [vmem:[%s2785_s11 + $0x18] sm:$0xff] }
 0xb89   :  { %1784 = vmatpush.msra.mxu3 %v1756_v11 }
 0xb8b   :  { %1785 = vmatpush.msra.mxu3 %v1755_v29 }
 0xb8d   :  { %1786 = vmatpush.msra.mxu3 %v1754_v30 }
 0xb8f   :  { %v1598_v12 = vld [vmem:[#allocation2 + $0x8] sm:$0xff] }
 0xb90   :  { %1882 = vmatmul.msk.f32.gmra.mxu2 %vm174_vm0, %v1598_v12 }
 0xbd7   :  { %v1622_v13 = vpop.f32.mrf.mxu2 }
 0xbd8   :  { %v2704_v14 = vadd.f32 %v1622_v13, %v2555_v43 }
 0xbda   :  { %v1632_v36 = vsel %vm174_vm0, %v2704_v14, 0.0 }
 0xbdb   :  { %1633 = vadd.xlane.f32.xlu0 %v1632_v36 }
 0xc13   :  { %v1625_v17 = vpop.f32.mrf.mxu2 }
 0xc14   :  { %v2709_v18 = vadd.f32 %v1625_v17, %v2560_v45 }
 0xc16   :  { %v1635_v19 = vsel %vm174_vm0, %v2709_v18, 0.0 }
 0xc17   :  { %1636 = vadd.xlane.f32.xlu2 %v1635_v19 }
 0xc4e   :  { %v1634_v20 = vpop.xlane.xlu0 %1633 }
 0xc4f   :  { %v1638_v15 = vmul.f32 %v1634_v20, %v2378_v10 }
 0xc51   :  { %v1640_v21 = vsub.f32 %v2704_v14, %v1638_v15 }
 0xc53   :  { %v1642_v22 = vmul.f32 %v1640_v21, %v1640_v21  ;;  %v1653_v53 = vmul.f32 %v1652_v51, %v1640_v21 }
 0xc55   :  { %v1644_v43 = vsel %vm174_vm0, %v1642_v22, 0.0 }
 0xc56   :  { %1645 = vadd.xlane.f32.xlu1 %v1644_v43 }
 0xc8a   :  { %v1637_v23 = vpop.xlane.xlu2 %1636 }
 0xc8b   :  { %v1639_v24 = vmul.f32 %v1637_v23, %v2378_v10 }
 0xc8d   :  { %v2718_v25 = vsub.f32 %v2709_v18, %v1639_v24 }
 0xc8f   :  { %v1643_v45 = vmul.f32 %v2718_v25, %v2718_v25  ;;  %v1654_v24 = vmul.f32 %v1652_v51, %v2718_v25  ;;  %v1753_v25 = vld [vmem:[%s2785_s11] sm:$0xff] }
 0xc90   :  { %1787 = vmatpush.msra.mxu3 %v1753_v25 }
 0xc91   :  { %v1647_v16 = vsel %vm174_vm0, %v1643_v45, 0.0 }
 0xc92   :  { %1648 = vadd.xlane.f32.xlu0 %v1647_v16 }
 0xcc9   :  { %v1646_v33 = vpop.xlane.xlu1 %1645 }
 0xcca   :  { %v1650_v34 = vmul.f32 %v1646_v33, %v2406_v31  ;;  %v1920_v33 = vld [vmem:[%s2784_s10] ss:$0 sm:$0xff]  ;;  %s2255_s10 = smov [#allocation17]  }
 0xccb   :  { %s1803_s11 = sshll.u32 %s2255_s10, 4  ;;  %s1804_s11 = int_to_ptr.vmem [resolvable:$true] %s1803_s11 }
 0xccc   :  { %2006 = vrsqrt.f32 %v1650_v34  ;;  %vm1662_vm15 = vcmp.eq.f32.partialorder %v1650_v34, inf  ;;  %v1665_v60 = vand.u32 2147483648, %v1650_v34  ;;  %vm1664_vm1 = vcmp.eq.f32.partialorder %v1650_v34, 0.0 }
 0xcd2   :  { %v2007_v10 = vpop.eup %2006 }
 0xcd3   :  { %v1656_v35 = vmul.f32 %v2007_v10, %v1650_v34 }
 0xcd5   :  { %v1657_v37 = vmul.f32 %v2007_v10, %v1656_v35 }
 0xcd7   :  { %v1658_v38 = vmul.f32 0.5, %v1657_v37 }
 0xcd9   :  { %v1659_v39 = vsub.f32 1.5, %v1658_v38 }
 0xcdb   :  { %v1660_v41 = vmul.f32 %v2007_v10, %v1659_v39 }
 0xcdd   :  { %v1661_v42 = vmul.f32 %v1660_v41, %v1650_v34  ;;  %v1921_v41 = vld [vmem:[%s2786_s12] ss:$0 sm:$0xff] }
 0xcdf   :  { %v1663_v44 = vsel %vm1662_vm15, %v1650_v34, %v1661_v42 }
 0xce0   :  { %v1666_v32 = vsel %vm1664_vm1, %v1665_v60, %v1663_v44 }
 0xce1   :  { %v1679_v46 = vadd.f32 1e-06, %v1666_v32 }
 0xce3   :  { %2008 = vrcp.f32 %v1679_v46  ;;  %v1692_v0 = vand.u32 2147483648, %v1679_v46  ;;  %v1690_v50 = vand.u32 2147483647, %v1679_v46  ;;  %vm1686_vm3 = vweird.f32 %v1679_v46 }
 0xce5   :  { %v1693_v52 = vor.u32 1.1754944e-38, %v1692_v0  ;;  %vm1691_vm6 = vcmp.eq.f32.partialorder %v1690_v50, 8.507059e+37 }
 0xce9   :  { %v2009_v47 = vpop.eup %2008 }
 0xcea   :  { %v1682_v48 = vmul.f32 %v2009_v47, %v1679_v46  ;;  %vm1687_vm2 = vweird.f32 %v2009_v47 }
 0xceb   :  { %vm1688_vm5 = vmor %vm1686_vm3, %vm1687_vm2 }
 0xcec   :  { %v1683_v49 = vsub.f32 1.0, %v1682_v48 }
 0xcee   :  { %v1684_v26 = vmul.f32 %v2009_v47, %v1683_v49 }
 0xcf0   :  { %v1685_v1 = vadd.f32 %v2009_v47, %v1684_v26 }
 0xcf2   :  { %v1689_v54 = vsel %vm1688_vm5, %v2009_v47, %v1685_v1 }
 0xcf3   :  { %v1694_v55 = vsel %vm1691_vm6, %v1693_v52, %v1689_v54 }
 0xcf4   :  { %v1695_v58 = vmul.f32 %v1694_v55, %v1653_v53 }
 0xcf6   :  { %v1712_v40 = vadd.f32 %v1711_v57, %v1695_v58 }
 0xcf8   :  { %1885 = vmatmul.msk.f32.vlgmr.msra.gmra.mxu1 %vm174_vm0, %v1712_v40 }
 0xd05   :  { %v1649_v59 = vpop.xlane.xlu0 %1648 }
 0xd06   :  { %v1651_v61 = vmul.f32 %v1649_v59, %v2406_v31 }
 0xd08   :  { %2010 = vrsqrt.f32 %v1651_v61  ;;  %vm1674_vm7 = vcmp.eq.f32.partialorder %v1651_v61, inf  ;;  %v1677_v9 = vand.u32 2147483648, %v1651_v61  ;;  %vm1676_vm8 = vcmp.eq.f32.partialorder %v1651_v61, 0.0 }
 0xd0e   :  { %v2011_v56 = vpop.eup %2010 }
 0xd0f   :  { %v1668_v62 = vmul.f32 %v2011_v56, %v1651_v61 }
 0xd11   :  { %v1669_v63 = vmul.f32 %v2011_v56, %v1668_v62 }
 0xd13   :  { %v1670_v2 = vmul.f32 0.5, %v1669_v63 }
 0xd15   :  { %v1671_v5 = vsub.f32 1.5, %v1670_v2 }
 0xd17   :  { %v1672_v31 = vmul.f32 %v2011_v56, %v1671_v5 }
 0xd19   :  { %v1673_v8 = vmul.f32 %v1672_v31, %v1651_v61 }
 0xd1b   :  { %v1675_v12 = vsel %vm1674_vm7, %v1651_v61, %v1673_v8 }
 0xd1c   :  { %v1678_v13 = vsel %vm1676_vm8, %v1677_v9, %v1675_v12 }
 0xd1d   :  { %v1680_v36 = vadd.f32 1e-06, %v1678_v13 }
 0xd1f   :  { %2012 = vrcp.f32 %v1680_v36  ;;  %v1707_v15 = vand.u32 2147483648, %v1680_v36  ;;  %v1705_v22 = vand.u32 2147483647, %v1680_v36  ;;  %vm1701_vm10 = vweird.f32 %v1680_v36 }
 0xd21   :  { %v1708_v23 = vor.u32 1.1754944e-38, %v1707_v15  ;;  %vm1706_vm12 = vcmp.eq.f32.partialorder %v1705_v22, 8.507059e+37 }
 0xd25   :  { %v2013_v17 = vpop.eup %2012 }
 0xd26   :  { %v1697_v19 = vmul.f32 %v2013_v17, %v1680_v36  ;;  %vm1702_vm9 = vweird.f32 %v2013_v17 }
 0xd27   :  { %vm1703_vm11 = vmor %vm1701_vm10, %vm1702_vm9 }
 0xd28   :  { %v1698_v20 = vsub.f32 1.0, %v1697_v19 }
 0xd2a   :  { %v1699_v21 = vmul.f32 %v2013_v17, %v1698_v20 }
 0xd2c   :  { %v1700_v43 = vadd.f32 %v2013_v17, %v1699_v21 }
 0xd2e   :  { %v1704_v45 = vsel %vm1703_vm11, %v2013_v17, %v1700_v43 }
 0xd2f   :  { %v1709_v16 = vsel %vm1706_vm12, %v1708_v23, %v1704_v45 }
 0xd30   :  { %v1710_v27 = vmul.f32 %v1709_v16, %v1654_v24 }
 0xd32   :  { %v1713_v28 = vadd.f32 %v1711_v57, %v1710_v27 }
 0xd34   :  { %1886 = vmatmul.msk.f32.gmra.mxu1 %vm174_vm0, %v1713_v28 }
 0xd75   :  { %v1745_v34 = vpop.f32.mrf.mxu1 }
 0xd76   :  { %v1746_v10 = vadd.f32 %v1920_v33, %v1745_v34 }
 0xd78   :  { %v1751_v35 = vmax.f32 %v1746_v10, 0.0 }
 0xd7a   :  { %1887 = vmatmul.msk.f32.vlgmr.msra.gmra.mxu3 %vm1765_vm13, %v1751_v35 }
 0xdb1   :  { %v1748_v37 = vpop.f32.mrf.mxu1 }
 0xdb2   :  { %v1749_v38 = vadd.f32 %v1920_v33, %v1748_v37 }
 0xdb4   :  { %v1752_v39 = vmax.f32 %v1749_v38, 0.0 }
 0xdb6   :  { %1888 = vmatmul.msk.f32.gmra.mxu3 %vm1765_vm13, %v1752_v39 }
 0xdfd   :  { %v1789_v42 = vpop.f32.mrf.mxu3 }
 0xdfe   :  { %v1790_v60 = vadd.f32 %v1921_v41, %v1789_v42 }
 0xe00   :  { %v1795_v44 = vadd.f32 %v1790_v60, %v2704_v14 }
 0xe02   :  { %1797 = vst.msk [vmem:[#allocation17] sm:$0xff] %vm174_vm0, %v1795_v44 }
 0xe39   :  { %v1792_v32 = vpop.f32.mrf.mxu3 }
 0xe3a   :  { %v1793_v46 = vadd.f32 %v1921_v41, %v1792_v32 }
 0xe3c   :  { %v1796_v47 = vadd.f32 %v1793_v46, %v2709_v18 }
 0xe3e   :  { %1798 = vst.msk [vmem:[#allocation17 + $0x8] sm:$0xff] %vm174_vm0, %v1796_v47 }
 0xe3f   :  { %1811 = dma.vmem_to_hbm [thread:$0]  %s1804_s11, 256, %s1806_s6, [#allocation5], %s2231_s21, %s2231_s21, %s2232_s22  }
 0xe40   :  { %2228 = dma.done.wait [#allocation5], 256  }
 0xe41   :  { %2229 = vsyncadd [#allocation5], 4294967040 }
 0xe42   :  { %1816 = vsyncpa [#allocation4], 1 }
 0xe43   :  { %1817 = vsyncpa [#allocation8], 1 }
 0xe44   :  { %1818 = vsyncpa [#allocation11], 1 }
 0xe45   :  { %1819 = vsyncpa [#allocation14], 1 }
 0xe46   :  { %1820 = vsyncpa [#allocation5], 1 }
 0xe47   :  { %1821 = vsyncpa [#allocation6], 1 }

</bundles_post_ra>
